<compile_context>
chip_gen: v7x
topology: tpu7x:2x2x1
jax: 0.10.0
libtpu: 0.0.40
codegen_flags: <defaults>
</compile_context>

<pallas_src>
import numpy as np
import jax
import jax.numpy as jnp
from jax import lax
from jax.experimental import pallas as pl
from jax.experimental.pallas import tpu as pltpu  # noqa: F401  (TPU backend)

# ------------------- static geometry (fixed by the module + test shape) -----
N = 2                  # batch
H = 16                 # input spatial (H == W)
KS = 5                 # conv kernel size
PAD = 2                # conv1 padding
C1 = 6                 # conv1 output channels
C2 = 16                # conv2 output channels

HP = H + 2 * PAD                                   # 20 : padded input spatial
IMG1 = HP * HP                                     # 400: per-image flat pitch
H1 = H                                             # 16 : conv1 output spatial
M1W = (N - 1) * IMG1 + (H1 - 1) * (HP + 1) + 1     # 716: widened conv1 columns
H1P = H1 // 2                                      # 8  : pool1 output spatial
IMG2 = H1P * H1P                                   # 64 : per-image pitch after pool1
M1P = N * IMG2                                     # 128: pooled conv1 columns
H2 = H1P - KS + 1                                  # 4  : conv2 output spatial
M2W = (N - 1) * IMG2 + (H2 - 1) * (H1P + 1) + 1    # 92 : widened conv2 columns
H2P = H2 // 2                                      # 2  : pool2 output spatial
M2P = N * H2P * H2P                                # 8  : final columns


# ----------------------------- fused Pallas kernel ---------------------------

def lenet_fused_kernel(xpf_ref, w1_ref, b1_ref, w2_ref, b2_ref,
                       s1_ref, s2_ref, o_ref):
    """conv1+relu+pool1+conv2+relu+pool2, entirely in VMEM.

    xpf_ref: (1, N*IMG1)    flattened zero-padded input (row pitch HP)
    w1_ref : (C1, KS*KS)    conv1 weights, columns ordered (kh, kw)
    b1_ref : (C1, 1)
    w2_ref : (C2, KS*KS*C1) conv2 weights, columns ordered (kh, kw, cin)
    b2_ref : (C2, 1)
    s1_ref : (M1W, M1P)     pool1 0/0.25 selection matrix
    s2_ref : (M2W, M2P)     pool2 0/0.25 selection matrix
    o_ref  : (N, C2, H2P*H2P)
    """
    xpf = xpf_ref[...]                                        # (1, 800)

    # ---- conv1: in-kernel im2col.  Tap (kh, kw) of the 5x5 window is one
    # contiguous lane-slice of the flattened padded image (widened-row trick).
    taps = [xpf[:, kh * HP + kw: kh * HP + kw + M1W]
            for kh in range(KS) for kw in range(KS)]          # 25 x (1, 716)
    p1 = jnp.concatenate(taps, axis=0)                        # (25, 716)
    a1 = jnp.dot(w1_ref[...], p1,
                 preferred_element_type=jnp.float32)          # (6, 716) lane-dense
    a1 = jnp.maximum(a1 + b1_ref[...], 0.0)                   # bias + ReLU

    # ---- pool1: 2x2/stride-2 average + drop garbage columns + re-layout to
    # conv2's flat grid -- all one constant matmul.
    a1p = jnp.dot(a1, s1_ref[...],
                  preferred_element_type=jnp.float32)         # (6, 128)

    # ---- conv2: 25 shifted taps; each tap contracts the 6 input channels.
    w2 = w2_ref[...]                                          # (16, 150)
    a2 = None
    for kh in range(KS):
        for kw in range(KS):
            k = kh * KS + kw
            s = kh * H1P + kw
            term = jnp.dot(w2[:, k * C1:(k + 1) * C1],
                           a1p[:, s: s + M2W],
                           preferred_element_type=jnp.float32)  # (16, 92)
            a2 = term if a2 is None else a2 + term
    a2 = jnp.maximum(a2 + b2_ref[...], 0.0)                   # bias + ReLU

    # ---- pool2: 2x2/stride-2 average + drop garbage columns.
    out = jnp.dot(a2, s2_ref[...],
                  preferred_element_type=jnp.float32)         # (16, 8)

    # Final columns are ordered (n, ho, wo): store per-image NCHW slabs.
    for n in range(N):
        o_ref[n] = out[:, n * H2P * H2P:(n + 1) * H2P * H2P]  # (16, 4)


# ----------------------- one-time parameter preparation ----------------------

def _pool1_matrix():
    s = np.zeros((M1W, M1P), np.float32)
    for n in range(N):
        for ho in range(H1P):
            for wo in range(H1P):
                q = n * IMG2 + ho * H1P + wo
                for dh in range(2):
                    for dw in range(2):
                        m = n * IMG1 + (2 * ho + dh) * HP + (2 * wo + dw)
                        s[m, q] = 0.25
    return jnp.asarray(s)


def _pool2_matrix():
    s = np.zeros((M2W, M2P), np.float32)
    for n in range(N):
        for ho in range(H2P):
            for wo in range(H2P):
                t = n * H2P * H2P + ho * H2P + wo
                for dh in range(2):
                    for dw in range(2):
                        m = n * IMG2 + (2 * ho + dh) * H1P + (2 * wo + dw)
                        s[m, t] = 0.25
    return jnp.asarray(s)


def prepare_params(w1, b1, w2, b2):
    """Hoisted constant prep: weight/bias reshapes + pooling selection mats."""
    w1m = jnp.asarray(w1, jnp.float32).reshape(C1, KS * KS)           # (6, 25)
    b1m = jnp.asarray(b1, jnp.float32).reshape(C1, 1)
    # columns ordered (kh, kw, cin) so each tap is a contiguous slice in-kernel
    w2m = jnp.transpose(jnp.asarray(w2, jnp.float32),
                        (0, 2, 3, 1)).reshape(C2, KS * KS * C1)       # (16, 150)
    b2m = jnp.asarray(b2, jnp.float32).reshape(C2, 1)
    return (w1m, b1m, w2m, b2m, _pool1_matrix(), _pool2_matrix())


# --------------------------------- forward -----------------------------------

@jax.jit
def net_forward(x_nchw, prepped):
    """Forward pass of Net.  x_nchw: (N, 1, 16, 16) f32 -> (N, 16, 2, 2) f32."""
    w1m, b1m, w2m, b2m, s1, s2 = prepped
    # Only layout prep outside the kernel: zero-pad + flatten the tiny input
    # into the widened-row layout the kernel lane-slices from.
    xpf = jnp.pad(x_nchw[:, 0].astype(jnp.float32),
                  ((0, 0), (PAD, PAD), (PAD, PAD))).reshape(1, N * IMG1)
    out = pl.pallas_call(
        lenet_fused_kernel,
        out_shape=jax.ShapeDtypeStruct((N, C2, H2P * H2P), jnp.float32),
    )(xpf, w1m, b1m, w2m, b2m, s1, s2)
    return out.reshape(N, C2, H2P, H2P)


# ---------------------------- pure-JAX reference ----------------------------

def _ref_forward(x_nchw, params):
    w1, b1, w2, b2 = params

    def conv(x, w, b, pad):
        y = lax.conv_general_dilated(
            x, w, window_strides=(1, 1), padding=[(pad, pad), (pad, pad)],
            dimension_numbers=("NCHW", "OIHW", "NCHW"))
        return jnp.maximum(y + b.reshape(1, -1, 1, 1), 0.0)

    def pool(x):
        s = lax.reduce_window(x, 0.0, lax.add, (1, 1, 2, 2), (1, 1, 2, 2), "VALID")
        return s / 4.0

    x = pool(conv(x_nchw, w1, b1, PAD))
    x = pool(conv(x, w2, b2, 0))
    return x


# --------------------------------- main -------------------------------------

if __name__ == "__main__":
    key = jax.random.PRNGKey(0)
    k_x, k_w1, k_b1, k_w2, k_b2 = jax.random.split(key, 5)

    # Input: N=2, C=1, H=W=16  (LeNet front-end at small spatial size).
    x = jax.random.normal(k_x, (N, 1, H, H), dtype=jnp.float32)

    # Deterministic parameter init (uniform, scaled by 1/sqrt(fan_in)).
    def init(k, shape, fan_in):
        bound = 1.0 / jnp.sqrt(jnp.float32(fan_in))
        return jax.random.uniform(k, shape, jnp.float32, -bound, bound)

    w1 = init(k_w1, (C1, 1, KS, KS), 1 * KS * KS)
    b1 = init(k_b1, (C1,), 1 * KS * KS)
    w2 = init(k_w2, (C2, C1, KS, KS), C1 * KS * KS)
    b2 = init(k_b2, (C2,), C1 * KS * KS)
    params = (w1, b1, w2, b2)

    prepped = prepare_params(*params)      # one-time constant prep

    out = net_forward(x, prepped)
    out = jax.block_until_ready(out)

    ref = jax.block_until_ready(_ref_forward(x, params))
    assert out.shape == (2, 16, 2, 2), out.shape
    assert jnp.allclose(out, ref, rtol=1e-4, atol=1e-4), "mismatch vs JAX reference"

    print("KERNEL_OK")
</pallas_src>

<mosaic_0001>
module attributes {stable_mosaic.version = 11 : i64} {
  func.func @lenet_fused_kernel(%arg0: memref<1x800xf32, #tpu.memory_space<vmem>>, %arg1: memref<6x25xf32, #tpu.memory_space<vmem>>, %arg2: memref<6x1xf32, #tpu.memory_space<vmem>>, %arg3: memref<16x150xf32, #tpu.memory_space<vmem>>, %arg4: memref<16x1xf32, #tpu.memory_space<vmem>>, %arg5: memref<716x128xf32, #tpu.memory_space<vmem>>, %arg6: memref<92x8xf32, #tpu.memory_space<vmem>>, %arg7: memref<2x16x4xf32, #tpu.memory_space<vmem>>) attributes {dimension_semantics = [], scalar_prefetch = 0 : i64, scratch_operands = 0 : i64, tpu.core_type = #tpu.core_type<tc>} {
    %c0 = arith.constant 0 : index
    %c0_0 = arith.constant 0 : index
    %0 = vector.load %arg0[%c0, %c0_0] : memref<1x800xf32, #tpu.memory_space<vmem>>, vector<1x800xf32>
    %1 = vector.extract_strided_slice %0 {offsets = [0, 0], sizes = [1, 716], strides = [1, 1]} : vector<1x800xf32> to vector<1x716xf32>
    %2 = vector.extract_strided_slice %0 {offsets = [0, 1], sizes = [1, 716], strides = [1, 1]} : vector<1x800xf32> to vector<1x716xf32>
    %3 = vector.extract_strided_slice %0 {offsets = [0, 2], sizes = [1, 716], strides = [1, 1]} : vector<1x800xf32> to vector<1x716xf32>
    %4 = vector.extract_strided_slice %0 {offsets = [0, 3], sizes = [1, 716], strides = [1, 1]} : vector<1x800xf32> to vector<1x716xf32>
    %5 = vector.extract_strided_slice %0 {offsets = [0, 4], sizes = [1, 716], strides = [1, 1]} : vector<1x800xf32> to vector<1x716xf32>
    %6 = vector.extract_strided_slice %0 {offsets = [0, 20], sizes = [1, 716], strides = [1, 1]} : vector<1x800xf32> to vector<1x716xf32>
    %7 = vector.extract_strided_slice %0 {offsets = [0, 21], sizes = [1, 716], strides = [1, 1]} : vector<1x800xf32> to vector<1x716xf32>
    %8 = vector.extract_strided_slice %0 {offsets = [0, 22], sizes = [1, 716], strides = [1, 1]} : vector<1x800xf32> to vector<1x716xf32>
    %9 = vector.extract_strided_slice %0 {offsets = [0, 23], sizes = [1, 716], strides = [1, 1]} : vector<1x800xf32> to vector<1x716xf32>
    %10 = vector.extract_strided_slice %0 {offsets = [0, 24], sizes = [1, 716], strides = [1, 1]} : vector<1x800xf32> to vector<1x716xf32>
    %11 = vector.extract_strided_slice %0 {offsets = [0, 40], sizes = [1, 716], strides = [1, 1]} : vector<1x800xf32> to vector<1x716xf32>
    %12 = vector.extract_strided_slice %0 {offsets = [0, 41], sizes = [1, 716], strides = [1, 1]} : vector<1x800xf32> to vector<1x716xf32>
    %13 = vector.extract_strided_slice %0 {offsets = [0, 42], sizes = [1, 716], strides = [1, 1]} : vector<1x800xf32> to vector<1x716xf32>
    %14 = vector.extract_strided_slice %0 {offsets = [0, 43], sizes = [1, 716], strides = [1, 1]} : vector<1x800xf32> to vector<1x716xf32>
    %15 = vector.extract_strided_slice %0 {offsets = [0, 44], sizes = [1, 716], strides = [1, 1]} : vector<1x800xf32> to vector<1x716xf32>
    %16 = vector.extract_strided_slice %0 {offsets = [0, 60], sizes = [1, 716], strides = [1, 1]} : vector<1x800xf32> to vector<1x716xf32>
    %17 = vector.extract_strided_slice %0 {offsets = [0, 61], sizes = [1, 716], strides = [1, 1]} : vector<1x800xf32> to vector<1x716xf32>
    %18 = vector.extract_strided_slice %0 {offsets = [0, 62], sizes = [1, 716], strides = [1, 1]} : vector<1x800xf32> to vector<1x716xf32>
    %19 = vector.extract_strided_slice %0 {offsets = [0, 63], sizes = [1, 716], strides = [1, 1]} : vector<1x800xf32> to vector<1x716xf32>
    %20 = vector.extract_strided_slice %0 {offsets = [0, 64], sizes = [1, 716], strides = [1, 1]} : vector<1x800xf32> to vector<1x716xf32>
    %21 = vector.extract_strided_slice %0 {offsets = [0, 80], sizes = [1, 716], strides = [1, 1]} : vector<1x800xf32> to vector<1x716xf32>
    %22 = vector.extract_strided_slice %0 {offsets = [0, 81], sizes = [1, 716], strides = [1, 1]} : vector<1x800xf32> to vector<1x716xf32>
    %23 = vector.extract_strided_slice %0 {offsets = [0, 82], sizes = [1, 716], strides = [1, 1]} : vector<1x800xf32> to vector<1x716xf32>
    %24 = vector.extract_strided_slice %0 {offsets = [0, 83], sizes = [1, 716], strides = [1, 1]} : vector<1x800xf32> to vector<1x716xf32>
    %25 = vector.extract_strided_slice %0 {offsets = [0, 84], sizes = [1, 716], strides = [1, 1]} : vector<1x800xf32> to vector<1x716xf32>
    %26 = tpu.concatenate %1, %2, %3, %4, %5, %6, %7, %8, %9, %10, %11, %12, %13, %14, %15, %16 in 0 : vector<1x716xf32>, vector<1x716xf32>, vector<1x716xf32>, vector<1x716xf32>, vector<1x716xf32>, vector<1x716xf32>, vector<1x716xf32>, vector<1x716xf32>, vector<1x716xf32>, vector<1x716xf32>, vector<1x716xf32>, vector<1x716xf32>, vector<1x716xf32>, vector<1x716xf32>, vector<1x716xf32>, vector<1x716xf32> -> vector<16x716xf32>
    %27 = tpu.concatenate %17, %18, %19, %20, %21, %22, %23, %24, %25 in 0 : vector<1x716xf32>, vector<1x716xf32>, vector<1x716xf32>, vector<1x716xf32>, vector<1x716xf32>, vector<1x716xf32>, vector<1x716xf32>, vector<1x716xf32>, vector<1x716xf32> -> vector<9x716xf32>
    %28 = tpu.concatenate %26, %27 in 0 : vector<16x716xf32>, vector<9x716xf32> -> vector<25x716xf32>
    %c0_1 = arith.constant 0 : index
    %c0_2 = arith.constant 0 : index
    %29 = vector.load %arg1[%c0_1, %c0_2] : memref<6x25xf32, #tpu.memory_space<vmem>>, vector<6x25xf32>
    %cst = arith.constant dense<0.000000e+00> : vector<6x716xf32>
    %30 = tpu.matmul %29, %28, %cst {dimension_numbers = #tpu.dot_dimension_numbers<[1], [0], [0], [1], [0, 0, 1, 1], [], []>} : vector<6x25xf32>, vector<25x716xf32>, vector<6x716xf32> -> vector<6x716xf32>
    %c0_3 = arith.constant 0 : index
    %c0_4 = arith.constant 0 : index
    %31 = vector.load %arg2[%c0_3, %c0_4] : memref<6x1xf32, #tpu.memory_space<vmem>>, vector<6x1xf32>
    %32 = vector.broadcast %31 : vector<6x1xf32> to vector<6x716xf32>
    %33 = arith.addf %30, %32 : vector<6x716xf32>
    %cst_5 = arith.constant 0.000000e+00 : f32
    %34 = vector.broadcast %cst_5 : f32 to vector<6x716xf32>
    %35 = arith.maximumf %33, %34 : vector<6x716xf32>
    %c0_6 = arith.constant 0 : index
    %c0_7 = arith.constant 0 : index
    %36 = vector.load %arg5[%c0_6, %c0_7] : memref<716x128xf32, #tpu.memory_space<vmem>>, vector<716x128xf32>
    %cst_8 = arith.constant dense<0.000000e+00> : vector<6x128xf32>
    %37 = tpu.matmul %35, %36, %cst_8 {dimension_numbers = #tpu.dot_dimension_numbers<[1], [0], [0], [1], [0, 0, 1, 1], [], []>} : vector<6x716xf32>, vector<716x128xf32>, vector<6x128xf32> -> vector<6x128xf32>
    %c0_9 = arith.constant 0 : index
    %c0_10 = arith.constant 0 : index
    %38 = vector.load %arg3[%c0_9, %c0_10] : memref<16x150xf32, #tpu.memory_space<vmem>>, vector<16x150xf32>
    %39 = vector.extract_strided_slice %38 {offsets = [0, 0], sizes = [16, 6], strides = [1, 1]} : vector<16x150xf32> to vector<16x6xf32>
    %40 = vector.extract_strided_slice %37 {offsets = [0, 0], sizes = [6, 92], strides = [1, 1]} : vector<6x128xf32> to vector<6x92xf32>
    %cst_11 = arith.constant dense<0.000000e+00> : vector<16x92xf32>
    %41 = tpu.matmul %39, %40, %cst_11 {dimension_numbers = #tpu.dot_dimension_numbers<[1], [0], [0], [1], [0, 0, 1, 1], [], []>} : vector<16x6xf32>, vector<6x92xf32>, vector<16x92xf32> -> vector<16x92xf32>
    %42 = vector.extract_strided_slice %38 {offsets = [0, 6], sizes = [16, 6], strides = [1, 1]} : vector<16x150xf32> to vector<16x6xf32>
    %43 = vector.extract_strided_slice %37 {offsets = [0, 1], sizes = [6, 92], strides = [1, 1]} : vector<6x128xf32> to vector<6x92xf32>
    %cst_12 = arith.constant dense<0.000000e+00> : vector<16x92xf32>
    %44 = tpu.matmul %42, %43, %cst_12 {dimension_numbers = #tpu.dot_dimension_numbers<[1], [0], [0], [1], [0, 0, 1, 1], [], []>} : vector<16x6xf32>, vector<6x92xf32>, vector<16x92xf32> -> vector<16x92xf32>
    %45 = arith.addf %41, %44 : vector<16x92xf32>
    %46 = vector.extract_strided_slice %38 {offsets = [0, 12], sizes = [16, 6], strides = [1, 1]} : vector<16x150xf32> to vector<16x6xf32>
    %47 = vector.extract_strided_slice %37 {offsets = [0, 2], sizes = [6, 92], strides = [1, 1]} : vector<6x128xf32> to vector<6x92xf32>
    %cst_13 = arith.constant dense<0.000000e+00> : vector<16x92xf32>
    %48 = tpu.matmul %46, %47, %cst_13 {dimension_numbers = #tpu.dot_dimension_numbers<[1], [0], [0], [1], [0, 0, 1, 1], [], []>} : vector<16x6xf32>, vector<6x92xf32>, vector<16x92xf32> -> vector<16x92xf32>
    %49 = arith.addf %45, %48 : vector<16x92xf32>
    %50 = vector.extract_strided_slice %38 {offsets = [0, 18], sizes = [16, 6], strides = [1, 1]} : vector<16x150xf32> to vector<16x6xf32>
    %51 = vector.extract_strided_slice %37 {offsets = [0, 3], sizes = [6, 92], strides = [1, 1]} : vector<6x128xf32> to vector<6x92xf32>
    %cst_14 = arith.constant dense<0.000000e+00> : vector<16x92xf32>
    %52 = tpu.matmul %50, %51, %cst_14 {dimension_numbers = #tpu.dot_dimension_numbers<[1], [0], [0], [1], [0, 0, 1, 1], [], []>} : vector<16x6xf32>, vector<6x92xf32>, vector<16x92xf32> -> vector<16x92xf32>
    %53 = arith.addf %49, %52 : vector<16x92xf32>
    %54 = vector.extract_strided_slice %38 {offsets = [0, 24], sizes = [16, 6], strides = [1, 1]} : vector<16x150xf32> to vector<16x6xf32>
    %55 = vector.extract_strided_slice %37 {offsets = [0, 4], sizes = [6, 92], strides = [1, 1]} : vector<6x128xf32> to vector<6x92xf32>
    %cst_15 = arith.constant dense<0.000000e+00> : vector<16x92xf32>
    %56 = tpu.matmul %54, %55, %cst_15 {dimension_numbers = #tpu.dot_dimension_numbers<[1], [0], [0], [1], [0, 0, 1, 1], [], []>} : vector<16x6xf32>, vector<6x92xf32>, vector<16x92xf32> -> vector<16x92xf32>
    %57 = arith.addf %53, %56 : vector<16x92xf32>
    %58 = vector.extract_strided_slice %38 {offsets = [0, 30], sizes = [16, 6], strides = [1, 1]} : vector<16x150xf32> to vector<16x6xf32>
    %59 = vector.extract_strided_slice %37 {offsets = [0, 8], sizes = [6, 92], strides = [1, 1]} : vector<6x128xf32> to vector<6x92xf32>
    %cst_16 = arith.constant dense<0.000000e+00> : vector<16x92xf32>
    %60 = tpu.matmul %58, %59, %cst_16 {dimension_numbers = #tpu.dot_dimension_numbers<[1], [0], [0], [1], [0, 0, 1, 1], [], []>} : vector<16x6xf32>, vector<6x92xf32>, vector<16x92xf32> -> vector<16x92xf32>
    %61 = arith.addf %57, %60 : vector<16x92xf32>
    %62 = vector.extract_strided_slice %38 {offsets = [0, 36], sizes = [16, 6], strides = [1, 1]} : vector<16x150xf32> to vector<16x6xf32>
    %63 = vector.extract_strided_slice %37 {offsets = [0, 9], sizes = [6, 92], strides = [1, 1]} : vector<6x128xf32> to vector<6x92xf32>
    %cst_17 = arith.constant dense<0.000000e+00> : vector<16x92xf32>
    %64 = tpu.matmul %62, %63, %cst_17 {dimension_numbers = #tpu.dot_dimension_numbers<[1], [0], [0], [1], [0, 0, 1, 1], [], []>} : vector<16x6xf32>, vector<6x92xf32>, vector<16x92xf32> -> vector<16x92xf32>
    %65 = arith.addf %61, %64 : vector<16x92xf32>
    %66 = vector.extract_strided_slice %38 {offsets = [0, 42], sizes = [16, 6], strides = [1, 1]} : vector<16x150xf32> to vector<16x6xf32>
    %67 = vector.extract_strided_slice %37 {offsets = [0, 10], sizes = [6, 92], strides = [1, 1]} : vector<6x128xf32> to vector<6x92xf32>
    %cst_18 = arith.constant dense<0.000000e+00> : vector<16x92xf32>
    %68 = tpu.matmul %66, %67, %cst_18 {dimension_numbers = #tpu.dot_dimension_numbers<[1], [0], [0], [1], [0, 0, 1, 1], [], []>} : vector<16x6xf32>, vector<6x92xf32>, vector<16x92xf32> -> vector<16x92xf32>
    %69 = arith.addf %65, %68 : vector<16x92xf32>
    %70 = vector.extract_strided_slice %38 {offsets = [0, 48], sizes = [16, 6], strides = [1, 1]} : vector<16x150xf32> to vector<16x6xf32>
    %71 = vector.extract_strided_slice %37 {offsets = [0, 11], sizes = [6, 92], strides = [1, 1]} : vector<6x128xf32> to vector<6x92xf32>
    %cst_19 = arith.constant dense<0.000000e+00> : vector<16x92xf32>
    %72 = tpu.matmul %70, %71, %cst_19 {dimension_numbers = #tpu.dot_dimension_numbers<[1], [0], [0], [1], [0, 0, 1, 1], [], []>} : vector<16x6xf32>, vector<6x92xf32>, vector<16x92xf32> -> vector<16x92xf32>
    %73 = arith.addf %69, %72 : vector<16x92xf32>
    %74 = vector.extract_strided_slice %38 {offsets = [0, 54], sizes = [16, 6], strides = [1, 1]} : vector<16x150xf32> to vector<16x6xf32>
    %75 = vector.extract_strided_slice %37 {offsets = [0, 12], sizes = [6, 92], strides = [1, 1]} : vector<6x128xf32> to vector<6x92xf32>
    %cst_20 = arith.constant dense<0.000000e+00> : vector<16x92xf32>
    %76 = tpu.matmul %74, %75, %cst_20 {dimension_numbers = #tpu.dot_dimension_numbers<[1], [0], [0], [1], [0, 0, 1, 1], [], []>} : vector<16x6xf32>, vector<6x92xf32>, vector<16x92xf32> -> vector<16x92xf32>
    %77 = arith.addf %73, %76 : vector<16x92xf32>
    %78 = vector.extract_strided_slice %38 {offsets = [0, 60], sizes = [16, 6], strides = [1, 1]} : vector<16x150xf32> to vector<16x6xf32>
    %79 = vector.extract_strided_slice %37 {offsets = [0, 16], sizes = [6, 92], strides = [1, 1]} : vector<6x128xf32> to vector<6x92xf32>
    %cst_21 = arith.constant dense<0.000000e+00> : vector<16x92xf32>
    %80 = tpu.matmul %78, %79, %cst_21 {dimension_numbers = #tpu.dot_dimension_numbers<[1], [0], [0], [1], [0, 0, 1, 1], [], []>} : vector<16x6xf32>, vector<6x92xf32>, vector<16x92xf32> -> vector<16x92xf32>
    %81 = arith.addf %77, %80 : vector<16x92xf32>
    %82 = vector.extract_strided_slice %38 {offsets = [0, 66], sizes = [16, 6], strides = [1, 1]} : vector<16x150xf32> to vector<16x6xf32>
    %83 = vector.extract_strided_slice %37 {offsets = [0, 17], sizes = [6, 92], strides = [1, 1]} : vector<6x128xf32> to vector<6x92xf32>
    %cst_22 = arith.constant dense<0.000000e+00> : vector<16x92xf32>
    %84 = tpu.matmul %82, %83, %cst_22 {dimension_numbers = #tpu.dot_dimension_numbers<[1], [0], [0], [1], [0, 0, 1, 1], [], []>} : vector<16x6xf32>, vector<6x92xf32>, vector<16x92xf32> -> vector<16x92xf32>
    %85 = arith.addf %81, %84 : vector<16x92xf32>
    %86 = vector.extract_strided_slice %38 {offsets = [0, 72], sizes = [16, 6], strides = [1, 1]} : vector<16x150xf32> to vector<16x6xf32>
    %87 = vector.extract_strided_slice %37 {offsets = [0, 18], sizes = [6, 92], strides = [1, 1]} : vector<6x128xf32> to vector<6x92xf32>
    %cst_23 = arith.constant dense<0.000000e+00> : vector<16x92xf32>
    %88 = tpu.matmul %86, %87, %cst_23 {dimension_numbers = #tpu.dot_dimension_numbers<[1], [0], [0], [1], [0, 0, 1, 1], [], []>} : vector<16x6xf32>, vector<6x92xf32>, vector<16x92xf32> -> vector<16x92xf32>
    %89 = arith.addf %85, %88 : vector<16x92xf32>
    %90 = vector.extract_strided_slice %38 {offsets = [0, 78], sizes = [16, 6], strides = [1, 1]} : vector<16x150xf32> to vector<16x6xf32>
    %91 = vector.extract_strided_slice %37 {offsets = [0, 19], sizes = [6, 92], strides = [1, 1]} : vector<6x128xf32> to vector<6x92xf32>
    %cst_24 = arith.constant dense<0.000000e+00> : vector<16x92xf32>
    %92 = tpu.matmul %90, %91, %cst_24 {dimension_numbers = #tpu.dot_dimension_numbers<[1], [0], [0], [1], [0, 0, 1, 1], [], []>} : vector<16x6xf32>, vector<6x92xf32>, vector<16x92xf32> -> vector<16x92xf32>
    %93 = arith.addf %89, %92 : vector<16x92xf32>
    %94 = vector.extract_strided_slice %38 {offsets = [0, 84], sizes = [16, 6], strides = [1, 1]} : vector<16x150xf32> to vector<16x6xf32>
    %95 = vector.extract_strided_slice %37 {offsets = [0, 20], sizes = [6, 92], strides = [1, 1]} : vector<6x128xf32> to vector<6x92xf32>
    %cst_25 = arith.constant dense<0.000000e+00> : vector<16x92xf32>
    %96 = tpu.matmul %94, %95, %cst_25 {dimension_numbers = #tpu.dot_dimension_numbers<[1], [0], [0], [1], [0, 0, 1, 1], [], []>} : vector<16x6xf32>, vector<6x92xf32>, vector<16x92xf32> -> vector<16x92xf32>
    %97 = arith.addf %93, %96 : vector<16x92xf32>
    %98 = vector.extract_strided_slice %38 {offsets = [0, 90], sizes = [16, 6], strides = [1, 1]} : vector<16x150xf32> to vector<16x6xf32>
    %99 = vector.extract_strided_slice %37 {offsets = [0, 24], sizes = [6, 92], strides = [1, 1]} : vector<6x128xf32> to vector<6x92xf32>
    %cst_26 = arith.constant dense<0.000000e+00> : vector<16x92xf32>
    %100 = tpu.matmul %98, %99, %cst_26 {dimension_numbers = #tpu.dot_dimension_numbers<[1], [0], [0], [1], [0, 0, 1, 1], [], []>} : vector<16x6xf32>, vector<6x92xf32>, vector<16x92xf32> -> vector<16x92xf32>
    %101 = arith.addf %97, %100 : vector<16x92xf32>
    %102 = vector.extract_strided_slice %38 {offsets = [0, 96], sizes = [16, 6], strides = [1, 1]} : vector<16x150xf32> to vector<16x6xf32>
    %103 = vector.extract_strided_slice %37 {offsets = [0, 25], sizes = [6, 92], strides = [1, 1]} : vector<6x128xf32> to vector<6x92xf32>
    %cst_27 = arith.constant dense<0.000000e+00> : vector<16x92xf32>
    %104 = tpu.matmul %102, %103, %cst_27 {dimension_numbers = #tpu.dot_dimension_numbers<[1], [0], [0], [1], [0, 0, 1, 1], [], []>} : vector<16x6xf32>, vector<6x92xf32>, vector<16x92xf32> -> vector<16x92xf32>
    %105 = arith.addf %101, %104 : vector<16x92xf32>
    %106 = vector.extract_strided_slice %38 {offsets = [0, 102], sizes = [16, 6], strides = [1, 1]} : vector<16x150xf32> to vector<16x6xf32>
    %107 = vector.extract_strided_slice %37 {offsets = [0, 26], sizes = [6, 92], strides = [1, 1]} : vector<6x128xf32> to vector<6x92xf32>
    %cst_28 = arith.constant dense<0.000000e+00> : vector<16x92xf32>
    %108 = tpu.matmul %106, %107, %cst_28 {dimension_numbers = #tpu.dot_dimension_numbers<[1], [0], [0], [1], [0, 0, 1, 1], [], []>} : vector<16x6xf32>, vector<6x92xf32>, vector<16x92xf32> -> vector<16x92xf32>
    %109 = arith.addf %105, %108 : vector<16x92xf32>
    %110 = vector.extract_strided_slice %38 {offsets = [0, 108], sizes = [16, 6], strides = [1, 1]} : vector<16x150xf32> to vector<16x6xf32>
    %111 = vector.extract_strided_slice %37 {offsets = [0, 27], sizes = [6, 92], strides = [1, 1]} : vector<6x128xf32> to vector<6x92xf32>
    %cst_29 = arith.constant dense<0.000000e+00> : vector<16x92xf32>
    %112 = tpu.matmul %110, %111, %cst_29 {dimension_numbers = #tpu.dot_dimension_numbers<[1], [0], [0], [1], [0, 0, 1, 1], [], []>} : vector<16x6xf32>, vector<6x92xf32>, vector<16x92xf32> -> vector<16x92xf32>
    %113 = arith.addf %109, %112 : vector<16x92xf32>
    %114 = vector.extract_strided_slice %38 {offsets = [0, 114], sizes = [16, 6], strides = [1, 1]} : vector<16x150xf32> to vector<16x6xf32>
    %115 = vector.extract_strided_slice %37 {offsets = [0, 28], sizes = [6, 92], strides = [1, 1]} : vector<6x128xf32> to vector<6x92xf32>
    %cst_30 = arith.constant dense<0.000000e+00> : vector<16x92xf32>
    %116 = tpu.matmul %114, %115, %cst_30 {dimension_numbers = #tpu.dot_dimension_numbers<[1], [0], [0], [1], [0, 0, 1, 1], [], []>} : vector<16x6xf32>, vector<6x92xf32>, vector<16x92xf32> -> vector<16x92xf32>
    %117 = arith.addf %113, %116 : vector<16x92xf32>
    %118 = vector.extract_strided_slice %38 {offsets = [0, 120], sizes = [16, 6], strides = [1, 1]} : vector<16x150xf32> to vector<16x6xf32>
    %119 = vector.extract_strided_slice %37 {offsets = [0, 32], sizes = [6, 92], strides = [1, 1]} : vector<6x128xf32> to vector<6x92xf32>
    %cst_31 = arith.constant dense<0.000000e+00> : vector<16x92xf32>
    %120 = tpu.matmul %118, %119, %cst_31 {dimension_numbers = #tpu.dot_dimension_numbers<[1], [0], [0], [1], [0, 0, 1, 1], [], []>} : vector<16x6xf32>, vector<6x92xf32>, vector<16x92xf32> -> vector<16x92xf32>
    %121 = arith.addf %117, %120 : vector<16x92xf32>
    %122 = vector.extract_strided_slice %38 {offsets = [0, 126], sizes = [16, 6], strides = [1, 1]} : vector<16x150xf32> to vector<16x6xf32>
    %123 = vector.extract_strided_slice %37 {offsets = [0, 33], sizes = [6, 92], strides = [1, 1]} : vector<6x128xf32> to vector<6x92xf32>
    %cst_32 = arith.constant dense<0.000000e+00> : vector<16x92xf32>
    %124 = tpu.matmul %122, %123, %cst_32 {dimension_numbers = #tpu.dot_dimension_numbers<[1], [0], [0], [1], [0, 0, 1, 1], [], []>} : vector<16x6xf32>, vector<6x92xf32>, vector<16x92xf32> -> vector<16x92xf32>
    %125 = arith.addf %121, %124 : vector<16x92xf32>
    %126 = vector.extract_strided_slice %38 {offsets = [0, 132], sizes = [16, 6], strides = [1, 1]} : vector<16x150xf32> to vector<16x6xf32>
    %127 = vector.extract_strided_slice %37 {offsets = [0, 34], sizes = [6, 92], strides = [1, 1]} : vector<6x128xf32> to vector<6x92xf32>
    %cst_33 = arith.constant dense<0.000000e+00> : vector<16x92xf32>
    %128 = tpu.matmul %126, %127, %cst_33 {dimension_numbers = #tpu.dot_dimension_numbers<[1], [0], [0], [1], [0, 0, 1, 1], [], []>} : vector<16x6xf32>, vector<6x92xf32>, vector<16x92xf32> -> vector<16x92xf32>
    %129 = arith.addf %125, %128 : vector<16x92xf32>
    %130 = vector.extract_strided_slice %38 {offsets = [0, 138], sizes = [16, 6], strides = [1, 1]} : vector<16x150xf32> to vector<16x6xf32>
    %131 = vector.extract_strided_slice %37 {offsets = [0, 35], sizes = [6, 92], strides = [1, 1]} : vector<6x128xf32> to vector<6x92xf32>
    %cst_34 = arith.constant dense<0.000000e+00> : vector<16x92xf32>
    %132 = tpu.matmul %130, %131, %cst_34 {dimension_numbers = #tpu.dot_dimension_numbers<[1], [0], [0], [1], [0, 0, 1, 1], [], []>} : vector<16x6xf32>, vector<6x92xf32>, vector<16x92xf32> -> vector<16x92xf32>
    %133 = arith.addf %129, %132 : vector<16x92xf32>
    %134 = vector.extract_strided_slice %38 {offsets = [0, 144], sizes = [16, 6], strides = [1, 1]} : vector<16x150xf32> to vector<16x6xf32>
    %135 = vector.extract_strided_slice %37 {offsets = [0, 36], sizes = [6, 92], strides = [1, 1]} : vector<6x128xf32> to vector<6x92xf32>
    %cst_35 = arith.constant dense<0.000000e+00> : vector<16x92xf32>
    %136 = tpu.matmul %134, %135, %cst_35 {dimension_numbers = #tpu.dot_dimension_numbers<[1], [0], [0], [1], [0, 0, 1, 1], [], []>} : vector<16x6xf32>, vector<6x92xf32>, vector<16x92xf32> -> vector<16x92xf32>
    %137 = arith.addf %133, %136 : vector<16x92xf32>
    %c0_36 = arith.constant 0 : index
    %c0_37 = arith.constant 0 : index
    %138 = vector.load %arg4[%c0_36, %c0_37] : memref<16x1xf32, #tpu.memory_space<vmem>>, vector<16x1xf32>
    %139 = vector.broadcast %138 : vector<16x1xf32> to vector<16x92xf32>
    %140 = arith.addf %137, %139 : vector<16x92xf32>
    %cst_38 = arith.constant 0.000000e+00 : f32
    %141 = vector.broadcast %cst_38 : f32 to vector<16x92xf32>
    %142 = arith.maximumf %140, %141 : vector<16x92xf32>
    %c0_39 = arith.constant 0 : index
    %c0_40 = arith.constant 0 : index
    %143 = vector.load %arg6[%c0_39, %c0_40] : memref<92x8xf32, #tpu.memory_space<vmem>>, vector<92x8xf32>
    %cst_41 = arith.constant dense<0.000000e+00> : vector<16x8xf32>
    %144 = tpu.matmul %142, %143, %cst_41 {dimension_numbers = #tpu.dot_dimension_numbers<[1], [0], [0], [1], [0, 0, 1, 1], [], []>} : vector<16x92xf32>, vector<92x8xf32>, vector<16x8xf32> -> vector<16x8xf32>
    %145 = vector.extract_strided_slice %144 {offsets = [0, 0], sizes = [16, 4], strides = [1, 1]} : vector<16x8xf32> to vector<16x4xf32>
    %c0_42 = arith.constant 0 : index
    %c0_43 = arith.constant 0 : index
    %c0_44 = arith.constant 0 : index
    %146 = vector.load %arg7[%c0_42, %c0_43, %c0_44] : memref<2x16x4xf32, #tpu.memory_space<vmem>>, vector<1x16x4xf32>
    %147 = vector.shape_cast %146 : vector<1x16x4xf32> to vector<16x4xf32>
    %148 = vector.shape_cast %145 : vector<16x4xf32> to vector<1x16x4xf32>
    tpu.vector_store %arg7[%c0_42, %c0_43, %c0_44], %148 {strides = array<i32>} : memref<2x16x4xf32, #tpu.memory_space<vmem>>, vector<1x16x4xf32>,
    %149 = vector.extract_strided_slice %144 {offsets = [0, 4], sizes = [16, 4], strides = [1, 1]} : vector<16x8xf32> to vector<16x4xf32>
    %c1 = arith.constant 1 : index
    %c0_45 = arith.constant 0 : index
    %c0_46 = arith.constant 0 : index
    %150 = vector.load %arg7[%c1, %c0_45, %c0_46] : memref<2x16x4xf32, #tpu.memory_space<vmem>>, vector<1x16x4xf32>
    %151 = vector.shape_cast %150 : vector<1x16x4xf32> to vector<16x4xf32>
    %152 = vector.shape_cast %149 : vector<16x4xf32> to vector<1x16x4xf32>
    tpu.vector_store %arg7[%c1, %c0_45, %c0_46], %152 {strides = array<i32>} : memref<2x16x4xf32, #tpu.memory_space<vmem>>, vector<1x16x4xf32>,
    return
  }
}

</mosaic_0001>

<bundles_post_ra>
// kernel: net_forward.1
= control target key start
LH: loop header
LB: loop body
LE: loop exit
PB: predicated region body
PF: predicated region fallthrough
CT: control target
= control target key end

     0   :  { %12 = vsyncpa [#allocation3], 0  ;;  %s4534_s24 = smov [#allocation2]   ;;  %s5716_s0 = inlined_call_operand.vmem [shape: f32[1,800], index: 0, kind: input, shape index: {}]   ;;  %s5717_s1 = inlined_call_operand.vmem [shape: f32[6,25], index: 1, kind: input, shape index: {}]   ;;  %s5718_s2 = inlined_call_operand.vmem [shape: f32[6,1], index: 2, kind: input, shape index: {}]   ;;  %s5719_s3 = inlined_call_operand.vmem [shape: f32[16,150], index: 3, kind: input, shape index: {}]   ;;  %s5720_s4 = inlined_call_operand.vmem [shape: f32[16,1], index: 4, kind: input, shape index: {}]   ;;  %s5721_s5 = inlined_call_operand.hbm [shape: f32[716,128], index: 5, kind: input, shape index: {}]   ;;  %s5722_s6 = inlined_call_operand.vmem [shape: f32[92,8], index: 6, kind: input, shape index: {}]   ;;  %s5723_s7 = inlined_call_operand.vmem [shape: f32[2,16,4], index: 7, kind: output, shape index: {}]  }
   0x1   :  { %s28_s25 = sshll.u32 %s4534_s24, 4  ;;  %s4510_s28 = scalar_lea.hbm %s5721_s5, 11520  ;;  %s29_s25 = int_to_ptr.vmem [resolvable:$true] %s28_s25 }
   0x2   :  { %p4511_p0 = scmp.ne.s32.totalorder %s5721_s5, %s4510_s28  ;;  %p4514_p1 = scmp.lt.u32.totalorder %s4510_s28, %s5721_s5 }
   0x4   :  { %p4516_p2 = pnand %p4514_p1, %p4511_p0 }
   0x6   :  { %4519 = shalt.err (!%p4516_p2)
}
   0x7   :  { %s4520_s10 = scalar_lea.vmem %s29_s25, 11520  ;;  %p4525_p4 = scmp.lt.s32.totalorder %s29_s25, %s29_s25 }
   0x8   :  { %p4521_p3 = scmp.ne.s32.totalorder %s29_s25, %s4520_s10  ;;  %p4526_p5 = scmp.lt.s32.totalorder %s4520_s10, %s4520_s10 }
   0xa   :  { %p4527_p6 = por %p4526_p5, %p4525_p4 }
   0xc   :  { %p4528_p7 = pnand %p4527_p6, %p4521_p3 }
   0xe   :  { %4531 = shalt.err (!%p4528_p7)
}
   0xf   :  { %s4535_s11 = smov 128   ;;  %s4536_s12 = smov 8  }
  0x10   :  { %34 = dma.hbm_to_vmem [thread:$0]  %s5721_s5, 11520, %s29_s25, [#allocation3], %s4535_s11, %s4535_s11, %s4536_s12  }
  0x11   :  { %4532 = dma.done.wait [#allocation3], 11520  }
  0x12   :  { %4533 = vsyncadd [#allocation3], 4294955776  ;;  %v42_v0 = vlaneseq  ;;  %v40_v6 = vld [vmem:[%s5716_s0] sm:$0x7f]  ;;  %s4537_s5 = smov 126   ;;  %s4538_s17 = smov 127  }
  0x13   :  { %s4539_s0 = smov 125   ;;  %s4540_s18 = smov 109   ;;  %vm84_vm0 = vcmask 1039360   ;;  %vm108_vm1 = vcmask 1031168   ;;  %vm439_vm2 = vcmask 1040384   ;;  %vm446_vm3 = vcmask 1041408  }
  0x14   :  { %v43_v1 = vshrl.u32 %v42_v0, 7  ;;  %s4541_s19 = smov 108   ;;  %s4542_s20 = smov 107   ;;  %vm132_vm4 = vcmask 1022976   ;;  %vm453_vm5 = vcmask 1042432   ;;  %vm460_vm6 = vcmask 1043456  }
  0x15   :  { %s4543_s21 = smov 106   ;;  %s4544_s22 = smov 105   ;;  %vm560_vm7 = vcmask 891904   ;;  %vm180_vm8 = vcmask 883712   ;;  %vm204_vm9 = vcmask 875520   ;;  %vm5731_vm10 = vcmask 1044480  }
  0x16   :  { %v48_v2 = vsub.s32 1, %v43_v1  ;;  %v52_v3 = vsub.s32 2, %v43_v1  ;;  %v44_v4 = vsub.s32 0, %v43_v1  ;;  %v56_v5 = vsub.s32 3, %v43_v1  ;;  %s4545_s23 = smov 104   ;;  %s4546_s24 = smov 88  }
  0x17   :  { %v60_v13 = vsub.s32 4, %v43_v1  ;;  %v64_v14 = vsub.s32 5, %v43_v1  ;;  %v410_v18 = vsub.s32 6, %v43_v1  ;;  %s4547_s25 = smov 87   ;;  %s4548_s26 = smov 124   ;;  %vm474_vm11 = vcmask 1045504  }
  0x18   :  { %v4645_v7 = vrot.slane %v40_v6, %v48_v2  ;;  %v4647_v8 = vrot.slane %v40_v6, %v52_v3  ;;  %v4649_v9 = vrot.slane %v40_v6, %v44_v4  ;;  %v4651_v10 = vrot.slane %v40_v6, %v56_v5  ;;  %s4549_s27 = smov 86   ;;  %s4550_s28 = smov 85  }
  0x19   :  { %v4677_v15 = vrot.slane %v40_v6, %v60_v13  ;;  %v4682_v16 = vrot.slane %v40_v6, %v64_v14  ;;  %v4707_v19 = vrot.slane %v40_v6, %v410_v18  ;;  %s4551_s29 = smov 84   ;;  %s4552_s30 = smov 68   ;;  %vm228_vm12 = vcmask 867328  }
  0x1a   :  { %v4655_v11 = vpack.i.bf16 %v4647_v8, %v4645_v7  ;;  %v4273_v12 = vpack.i.bf16 %v4649_v9, %v4651_v10  ;;  %v4383_v20 = vpack.i.bf16 %v4651_v10, %v4649_v9  ;;  %vm5724_vm13 = vcmask 1046528   ;;  %s4553_s8 = smov 67   ;;  %s4558_s14 = smov 122  }
  0x1b   :  { %v4689_v17 = vpack.i.bf16 %v4682_v16, %v4677_v15  ;;  %vm252_vm14 = vcmask 859136   ;;  %vm276_vm15 = vcmask 850944   ;;  %s4570_s9 = smov 62   ;;  %s4572_s10 = smov 56  }
  0x1c   :  { %4269 = vrot.lane.b32.xlu1 %v4655_v11, %s4537_s5  ;;  %4259 = vrot.lane.b32.xlu0 %v4655_v11, %s4538_s17  ;;  %s4575_s11 = smov 38   ;;  %s4579_s13 = smov 101  }
  0x1d   :  { %s4581_s15 = smov 20   ;;  %s4583_s16 = smov 96  }
  0x20   :  { %4274 = vrot.lane.b32.xlu1 %v4273_v12, %s4537_s5  ;;  %4264 = vrot.lane.b32.xlu0 %v4273_v12, %s4538_s17 }
  0x24   :  { %4284 = vrot.lane.b32.xlu1 %v4273_v12, %s4539_s0  ;;  %4279 = vrot.lane.b32.xlu0 %v4655_v11, %s4539_s0 }
  0x28   :  { %4294 = vrot.lane.b32.xlu1 %v4273_v12, %s4540_s18  ;;  %4289 = vrot.lane.b32.xlu0 %v4655_v11, %s4540_s18 }
  0x2c   :  { %4304 = vrot.lane.b32.xlu1 %v4273_v12, %s4541_s19  ;;  %4299 = vrot.lane.b32.xlu0 %v4655_v11, %s4541_s19 }
  0x30   :  { %4314 = vrot.lane.b32.xlu1 %v4273_v12, %s4542_s20  ;;  %4309 = vrot.lane.b32.xlu0 %v4655_v11, %s4542_s20 }
  0x34   :  { %4324 = vrot.lane.b32.xlu1 %v4273_v12, %s4543_s21  ;;  %4319 = vrot.lane.b32.xlu0 %v4655_v11, %s4543_s21 }
  0x38   :  { %4334 = vrot.lane.b32.xlu1 %v4273_v12, %s4544_s22  ;;  %4329 = vrot.lane.b32.xlu0 %v4655_v11, %s4544_s22 }
  0x3c   :  { %4344 = vrot.lane.b32.xlu1 %v4689_v17, %s4537_s5  ;;  %4339 = vrot.lane.b32.xlu0 %v4689_v17, %s4538_s17 }
  0x40   :  { %4354 = vrot.lane.b32.xlu1 %v4689_v17, %s4540_s18  ;;  %4349 = vrot.lane.b32.xlu0 %v4689_v17, %s4539_s0 }
  0x44   :  { %4364 = vrot.lane.b32.xlu1 %v4689_v17, %s4542_s20  ;;  %4359 = vrot.lane.b32.xlu0 %v4689_v17, %s4541_s19 }
  0x48   :  { %4374 = vrot.lane.b32.xlu1 %v4689_v17, %s4544_s22  ;;  %4369 = vrot.lane.b32.xlu0 %v4689_v17, %s4543_s21 }
  0x4c   :  { %536 = vrot.lane.b32.xlu1 %v4707_v19, %s4537_s5  ;;  %531 = vrot.lane.b32.xlu0 %v4707_v19, %s4538_s17 }
  0x50   :  { %558 = vrot.lane.b32.xlu1 %v4707_v19, %s4540_s18  ;;  %541 = vrot.lane.b32.xlu0 %v4707_v19, %s4539_s0 }
  0x54   :  { %574 = vrot.lane.b32.xlu1 %v4707_v19, %s4541_s19  ;;  %4379 = vrot.lane.b32.xlu0 %v4655_v11, %s4545_s23 }
  0x58   :  { %4389 = vrot.lane.b32.xlu1 %v4655_v11, %s4546_s24  ;;  %4384 = vrot.lane.b32.xlu0 %v4383_v20, %s4545_s23 }
  0x5c   :  { %4394 = vrot.lane.b32.xlu1 %v4383_v20, %s4546_s24  ;;  %579 = vrot.lane.b32.xlu0 %v4707_v19, %s4542_s20  ;;  %s4559_s20 = smov 116  }
  0x60   :  { %584 = vrot.lane.b32.xlu1 %v4707_v19, %s4543_s21  ;;  %4399 = vrot.lane.b32.xlu0 %v4655_v11, %s4547_s25  ;;  %s4560_s21 = smov 110  }
  0x64   :  { %312 = vrot.lane.b32.xlu1 %v4649_v9, %s4547_s25  ;;  %4404 = vrot.lane.b32.xlu0 %v4655_v11, %s4548_s26 }
  0x68   :  { %589 = vrot.lane.b32.xlu1 %v4707_v19, %s4544_s22  ;;  %4409 = vrot.lane.b32.xlu0 %v4655_v11, %s4549_s27  ;;  %s4563_s22 = smov 120  }
  0x6c   :  { %336 = vrot.lane.b32.xlu1 %v4649_v9, %s4549_s27  ;;  %144 = vrot.lane.b32.xlu0 %v4649_v9, %s4548_s26 }
  0x70   :  { %4414 = vrot.lane.b32.xlu0 %v4655_v11, %s4550_s28  ;;  %360 = vrot.lane.b32.xlu1 %v4649_v9, %s4550_s28 }
  0x74   :  { %4419 = vrot.lane.b32.xlu0 %v4655_v11, %s4551_s29  ;;  %384 = vrot.lane.b32.xlu1 %v4649_v9, %s4551_s29 }
  0x78   :  { %4424 = vrot.lane.b32.xlu0 %v4655_v11, %s4552_s30  ;;  %412 = vrot.lane.b32.xlu1 %v4649_v9, %s4552_s30 }
  0x8e   :  { %v4270_v21 = vpop.permute.xlu1 %4269  ;;  %v4260_v22 = vpop.permute.xlu0 %4259 }
  0x8f   :  { %v4262_v25 = vunpack.i.h.bf16 %v4260_v22  ;;  %v4261_v26 = vunpack.i.l.bf16 %v4260_v22  ;;  %v4272_v31 = vunpack.i.h.bf16 %v4270_v21  ;;  %v4271_v32 = vunpack.i.l.bf16 %v4270_v21 }
  0x91   :  { %v86_v33 = vsel %vm84_vm0, %v4261_v26, %v4262_v25  ;;  %v110_v40 = vsel %vm108_vm1, %v4271_v32, %v4272_v31 }
  0x92   :  { %v4757_v23 = vpop.permute.xlu1 %4274  ;;  %v4759_v24 = vpop.permute.xlu0 %4264  ;;  %v441_v41 = vsel %vm439_vm2, %v4645_v7, %v86_v33 }
  0x93   :  { %v4267_v27 = vunpack.i.h.bf16 %v4759_v24  ;;  %v4266_v28 = vunpack.i.l.bf16 %v4759_v24  ;;  %v4277_v34 = vunpack.i.h.bf16 %v4757_v23  ;;  %v4276_v35 = vunpack.i.l.bf16 %v4757_v23 }
  0x94   :  { %v448_v59 = vsel %vm446_vm3, %v441_v41, %v110_v40 }
  0x95   :  { %v85_v36 = vsel %vm84_vm0, %v4267_v27, %v4261_v26  ;;  %v87_v37 = vsel %vm84_vm0, %v4262_v25, %v4266_v28  ;;  %v109_v44 = vsel %vm108_vm1, %v4277_v34, %v4271_v32  ;;  %v111_v45 = vsel %vm108_vm1, %v4272_v31, %v4276_v35 }
  0x96   :  { %v4763_v29 = vpop.permute.xlu1 %4284  ;;  %v4280_v30 = vpop.permute.xlu0 %4279  ;;  %v440_v48 = vsel %vm439_vm2, %v4649_v9, %v85_v36  ;;  %v442_v49 = vsel %vm439_vm2, %v4647_v8, %v87_v37 }
  0x97   :  { %v4287_v42 = vunpack.i.h.bf16 %v4763_v29  ;;  %v4281_v43 = vunpack.i.l.bf16 %v4280_v30  ;;  %v4286_v46 = vunpack.i.l.bf16 %v4763_v29  ;;  %v4282_v47 = vunpack.i.h.bf16 %v4280_v30 }
  0x98   :  { %v447_v61 = vsel %vm446_vm3, %v440_v48, %v109_v44  ;;  %v449_v62 = vsel %vm446_vm3, %v442_v49, %v111_v45 }
  0x99   :  { %v133_v56 = vsel %vm132_vm4, %v4287_v42, %v4281_v43  ;;  %v135_v60 = vsel %vm132_vm4, %v4282_v47, %v4286_v46  ;;  %v134_v63 = vsel %vm132_vm4, %v4281_v43, %v4282_v47 }
  0x9a   :  { %v4772_v38 = vpop.permute.xlu1 %4294  ;;  %v4290_v39 = vpop.permute.xlu0 %4289  ;;  %v4803_v3 = vsel %vm453_vm5, %v447_v61, %v133_v56  ;;  %v4817_v14 = vsel %vm453_vm5, %v448_v59, %v134_v63  ;;  %v4820_v18 = vsel %vm453_vm5, %v449_v62, %v135_v60 }
  0x9b   :  { %v4297_v50 = vunpack.i.h.bf16 %v4772_v38  ;;  %v4291_v51 = vunpack.i.l.bf16 %v4290_v39  ;;  %v4296_v52 = vunpack.i.l.bf16 %v4772_v38  ;;  %v4292_v53 = vunpack.i.h.bf16 %v4290_v39 }
  0x9d   :  { %v561_v0 = vsel %vm560_vm7, %v4297_v50, %v4291_v51  ;;  %v563_v4 = vsel %vm560_vm7, %v4292_v53, %v4296_v52  ;;  %v562_v5 = vsel %vm560_vm7, %v4291_v51, %v4292_v53 }
  0x9e   :  { %v4789_v54 = vpop.permute.xlu1 %4304  ;;  %v4300_v55 = vpop.permute.xlu0 %4299  ;;  %v598_v20 = vsel %vm460_vm6, %v4803_v3, %v561_v0  ;;  %v599_v21 = vsel %vm460_vm6, %v4817_v14, %v562_v5  ;;  %v600_v27 = vsel %vm460_vm6, %v4820_v18, %v563_v4 }
  0x9f   :  { %v4302_v57 = vunpack.i.h.bf16 %v4300_v55  ;;  %v4301_v58 = vunpack.i.l.bf16 %v4300_v55  ;;  %v4307_v1 = vunpack.i.h.bf16 %v4789_v54  ;;  %v4306_v2 = vunpack.i.l.bf16 %v4789_v54 }
  0xa1   :  { %v4810_v6 = vsel %vm180_vm8, %v4301_v58, %v4302_v57  ;;  %v4829_v22 = vsel %vm180_vm8, %v4302_v57, %v4306_v2  ;;  %v4832_v25 = vsel %vm180_vm8, %v4307_v1, %v4301_v58 }
  0xa2   :  { %v4812_v7 = vpop.permute.xlu1 %4314  ;;  %v4310_v8 = vpop.permute.xlu0 %4309  ;;  %v606_v34 = vsel %vm5731_vm10, %v599_v21, %v4810_v6  ;;  %v607_v41 = vsel %vm5731_vm10, %v600_v27, %v4829_v22  ;;  %v605_v43 = vsel %vm5731_vm10, %v598_v20, %v4832_v25 }
  0xa3   :  { %v4317_v9 = vunpack.i.h.bf16 %v4812_v7  ;;  %v4316_v11 = vunpack.i.l.bf16 %v4812_v7  ;;  %v4312_v12 = vunpack.i.h.bf16 %v4310_v8  ;;  %v4311_v13 = vunpack.i.l.bf16 %v4310_v8 }
  0xa5   :  { %v4835_v26 = vsel %vm204_vm9, %v4311_v13, %v4312_v12  ;;  %v4842_v30 = vsel %vm204_vm9, %v4312_v12, %v4316_v11  ;;  %v4845_v31 = vsel %vm204_vm9, %v4317_v9, %v4311_v13  ;;  %v4554_v9 = vmov 0.0  }
  0xa6   :  { %v4847_v32 = vpop.permute.xlu1 %4324  ;;  %v4320_v33 = vpop.permute.xlu0 %4319  ;;  %v613_v42 = vsel %vm474_vm11, %v606_v34, %v4835_v26  ;;  %v614_v47 = vsel %vm474_vm11, %v607_v41, %v4842_v30  ;;  %v612_v55 = vsel %vm474_vm11, %v605_v43, %v4845_v31  ;;  %767 = vmatprep.mubr.f32.mxu1 %v4554_v9 }
  0xa7   :  { %v4327_v36 = vunpack.i.h.bf16 %v4847_v32  ;;  %v4326_v37 = vunpack.i.l.bf16 %v4847_v32  ;;  %v4322_v39 = vunpack.i.h.bf16 %v4320_v33  ;;  %v4321_v40 = vunpack.i.l.bf16 %v4320_v33 }
  0xa9   :  { %v4860_v44 = vsel %vm228_vm12, %v4321_v40, %v4322_v39  ;;  %v4865_v45 = vsel %vm228_vm12, %v4322_v39, %v4326_v37  ;;  %v4870_v48 = vsel %vm228_vm12, %v4327_v36, %v4321_v40  ;;  %v4453_v39 = vpack.i.bf16 %v4677_v15, %v4651_v10 }
  0xaa   :  { %v4872_v49 = vpop.permute.xlu1 %4334  ;;  %v4330_v50 = vpop.permute.xlu0 %4329  ;;  %v620_v51 = vsel %vm5724_vm13, %v613_v42, %v4860_v44  ;;  %v621_v53 = vsel %vm5724_vm13, %v614_v47, %v4865_v45  ;;  %v619_v61 = vsel %vm5724_vm13, %v612_v55, %v4870_v48 }
  0xab   :  { %v4337_v56 = vunpack.i.h.bf16 %v4872_v49  ;;  %v4336_v57 = vunpack.i.l.bf16 %v4872_v49  ;;  %v4332_v58 = vunpack.i.h.bf16 %v4330_v50  ;;  %v4331_v59 = vunpack.i.l.bf16 %v4330_v50 }
  0xac   :  { %v4433_v60 = vpack.i.bf16 %v621_v53, %v620_v51 }
  0xad   :  { %v4885_v62 = vsel %vm252_vm14, %v4331_v59, %v4332_v58  ;;  %v4890_v63 = vsel %vm252_vm14, %v4332_v58, %v4336_v57  ;;  %v4893_v0 = vsel %vm252_vm14, %v4337_v56, %v4331_v59 }
  0xae   :  { %4434 = vrot.lane.b32.xlu0 %v4433_v60, %s4553_s8  ;;  %v4345_v1 = vpop.permute.xlu1 %4344  ;;  %v4340_v4 = vpop.permute.xlu0 %4339  ;;  %v4428_v5 = vpack.i.bf16 %v4890_v63, %v4885_v62  ;;  %v4438_v8 = vpack.i.bf16 %v4893_v0, %v619_v61 }
  0xaf   :  { %v4900_v12 = vunpack.i.h.bf16 %v4345_v1  ;;  %v4902_v13 = vunpack.i.h.bf16 %v4340_v4  ;;  %v4341_v34 = vunpack.i.l.bf16 %v4340_v4  ;;  %v4346_v42 = vunpack.i.l.bf16 %v4345_v1 }
  0xb0   :  { %4429 = vrot.lane.b32.xlu1 %v4428_v5, %s4553_s8 }
  0xb1   :  { %v445_v20 = vsel %vm439_vm2, %v4682_v16, %v4902_v13  ;;  %v89_v40 = vsel %vm84_vm0, %v4341_v34, %v4902_v13  ;;  %v113_v50 = vsel %vm108_vm1, %v4346_v42, %v4900_v12  ;;  %v88_v56 = vsel %vm84_vm0, %v4266_v28, %v4341_v34 }
  0xb2   :  { %4439 = vrot.lane.b32.xlu0 %v4438_v8, %s4553_s8  ;;  %v4909_v21 = vpop.permute.xlu1 %4354  ;;  %v4350_v27 = vpop.permute.xlu0 %4349  ;;  %v452_v33 = vsel %vm446_vm3, %v445_v20, %v4900_v12  ;;  %v444_v51 = vsel %vm439_vm2, %v4677_v15, %v89_v40  ;;  %v112_v61 = vsel %vm108_vm1, %v4276_v35, %v4346_v42  ;;  %v443_v24 = vsel %vm439_vm2, %v4651_v10, %v88_v56 }
  0xb3   :  { %v4913_v36 = vunpack.i.h.bf16 %v4350_v27  ;;  %v4357_v53 = vunpack.i.h.bf16 %v4909_v21  ;;  %v4351_v55 = vunpack.i.l.bf16 %v4350_v27  ;;  %v4356_v59 = vunpack.i.l.bf16 %v4909_v21 }
  0xb4   :  { %4444 = vrot.lane.b32.xlu1 %v4689_v17, %s4545_s23  ;;  %v451_v15 = vsel %vm446_vm3, %v444_v51, %v113_v50  ;;  %v450_v27 = vsel %vm446_vm3, %v443_v24, %v112_v61 }
  0xb5   :  { %v4923_v41 = vsel %vm453_vm5, %v452_v33, %v4913_v36  ;;  %v137_v60 = vsel %vm132_vm4, %v4351_v55, %v4913_v36  ;;  %v565_v28 = vsel %vm560_vm7, %v4356_v59, %v4357_v53  ;;  %v136_v1 = vsel %vm132_vm4, %v4286_v46, %v4351_v55 }
  0xb6   :  { %4449 = vrot.lane.b32.xlu0 %v4689_v17, %s4546_s24  ;;  %v4365_v43 = vpop.permute.xlu1 %4364  ;;  %v4360_v47 = vpop.permute.xlu0 %4359  ;;  %v4954_v4 = vsel %vm453_vm5, %v451_v15, %v137_v60  ;;  %v564_v29 = vsel %vm560_vm7, %v4296_v52, %v4356_v59  ;;  %v4967_v46 = vsel %vm453_vm5, %v450_v27, %v136_v1  ;;  %s4564_s24 = smov 92  }
  0xb7   :  { %v4956_v5 = vunpack.i.h.bf16 %v4360_v47  ;;  %v4361_v8 = vunpack.i.l.bf16 %v4360_v47  ;;  %v4366_v33 = vunpack.i.l.bf16 %v4365_v43  ;;  %v4969_v34 = vunpack.i.h.bf16 %v4365_v43 }
  0xb8   :  { %4454 = vrot.lane.b32.xlu1 %v4453_v39, %s4547_s25  ;;  %v602_v40 = vsel %vm460_vm6, %v4954_v4, %v565_v28 }
  0xb9   :  { %v4976_v42 = vsel %vm180_vm8, %v4306_v2, %v4361_v8  ;;  %v4980_v47 = vsel %vm180_vm8, %v4361_v8, %v4956_v5  ;;  %v4997_v2 = vsel %vm204_vm9, %v4316_v11, %v4366_v33  ;;  %v5005_v49 = vsel %vm204_vm9, %v4366_v33, %v4969_v34 }
  0xba   :  { %4459 = vrot.lane.b32.xlu0 %v4453_v39, %s4548_s26  ;;  %v4375_v17 = vpop.permute.xlu1 %4374  ;;  %v4370_v58 = vpop.permute.xlu0 %4369  ;;  %v609_v7 = vsel %vm5731_vm10, %v602_v40, %v4980_v47 }
  0xbb   :  { %v4959_v20 = vunpack.i.h.bf16 %v4375_v17  ;;  %v4376_v10 = vunpack.i.l.bf16 %v4375_v17  ;;  %v4982_v38 = vunpack.i.h.bf16 %v4370_v58  ;;  %v4371_v52 = vunpack.i.l.bf16 %v4370_v58 }
  0xbc   :  { %4464 = vrot.lane.b32.xlu1 %v4453_v39, %s4549_s27  ;;  %v616_v32 = vsel %vm474_vm11, %v609_v7, %v5005_v49 }
  0xbd   :  { %v4988_v51 = vsel %vm252_vm14, %v4336_v57, %v4376_v10  ;;  %v4992_v54 = vsel %vm252_vm14, %v4376_v10, %v4959_v20  ;;  %v5022_v58 = vsel %vm228_vm12, %v4326_v37, %v4371_v52  ;;  %v5026_v59 = vsel %vm228_vm12, %v4371_v52, %v4982_v38 }
  0xbe   :  { %4469 = vrot.lane.b32.xlu0 %v4453_v39, %s4550_s28  ;;  %v537_v23 = vpop.permute.xlu1 %536  ;;  %v532_v35 = vpop.permute.xlu0 %531  ;;  %v4483_v17 = vpack.i.bf16 %v4992_v54, %v4988_v51  ;;  %v623_v24 = vsel %vm5724_vm13, %v616_v32, %v5026_v59 }
  0xbf   :  { %v593_v57 = vsel %vm439_vm2, %v4707_v19, %v532_v35  ;;  %v533_v60 = vsel %vm84_vm0, %v4902_v13, %v532_v35  ;;  %v538_v28 = vsel %vm108_vm1, %v4900_v12, %v537_v23  ;;  %vm300_vm0 = vcmask 719872  }
  0xc0   :  { %4474 = vrot.lane.b32.xlu1 %v4453_v39, %s4551_s29  ;;  %v595_v15 = vsel %vm446_vm3, %v593_v57, %v537_v23  ;;  %v592_v13 = vsel %vm439_vm2, %v4682_v16, %v533_v60  ;;  %vm156_vm1 = vcmask 1014784  }
  0xc1   :  { %v594_v23 = vsel %vm446_vm3, %v592_v13, %v538_v28 }
  0xc2   :  { %4479 = vrot.lane.b32.xlu0 %v4453_v39, %s4552_s30  ;;  %v559_v50 = vpop.permute.xlu1 %558  ;;  %v542_v43 = vpop.permute.xlu0 %541  ;;  %v601_v39 = vsel %vm460_vm6, %v4967_v46, %v564_v29 }
  0xc3   :  { %v608_v55 = vsel %vm5731_vm10, %v601_v39, %v4976_v42  ;;  %v543_v35 = vsel %vm132_vm4, %v4913_v36, %v542_v43  ;;  %v597_v10 = vsel %vm453_vm5, %v595_v15, %v542_v43  ;;  %v4493_v36 = vpack.i.bf16 %v4707_v19, %v4682_v16 }
  0xc4   :  { %322 = vrot.lane.b32.xlu1 %v4682_v16, %s4547_s25  ;;  %v615_v61 = vsel %vm474_vm11, %v608_v55, %v4997_v2  ;;  %v566_v40 = vsel %vm560_vm7, %v4357_v53, %v559_v50  ;;  %v596_v52 = vsel %vm453_vm5, %v594_v23, %v543_v35  ;;  %v604_v43 = vsel %vm460_vm6, %v597_v10, %v559_v50  ;;  %s4566_s25 = smov 118  }
  0xc5   :  { %v622_v37 = vsel %vm5724_vm13, %v615_v61, %v5022_v58  ;;  %vm324_vm4 = vcmask 711680   ;;  %vm5732_vm7 = vcmask 703488  }
  0xc6   :  { %154 = vrot.lane.b32.xlu0 %v4682_v16, %s4548_s26  ;;  %v575_v11 = vpop.permute.xlu1 %574  ;;  %v5015_v56 = vpop.permute.xlu0 %4379  ;;  %v4488_v12 = vpack.i.bf16 %v623_v24, %v622_v37 }
  0xc7   :  { %v4382_v27 = vunpack.i.h.bf16 %v5015_v56  ;;  %v576_v7 = vsel %vm180_vm8, %v4956_v5, %v575_v11  ;;  %v611_v50 = vsel %vm5731_vm10, %v604_v43, %v575_v11  ;;  %v681_v43 = vld [vmem:[%s5718_s2] sm:$0x3f]  ;;  %vm5728_vm8 = vcmask 695296   ;;  %s4573_s2 = smov 50  }
  0xc8   :  { %4484 = vrot.lane.b32.xlu1 %v4483_v17, %s4553_s8 }
  0xca   :  { %370 = vrot.lane.b32.xlu0 %v4682_v16, %s4550_s28  ;;  %v5046_v1 = vpop.permute.xlu1 %4389  ;;  %v5048_v8 = vpop.permute.xlu0 %4384  ;;  %s4567_s28 = smov 80  }
  0xcb   :  { %v4387_v33 = vunpack.i.h.bf16 %v5048_v8  ;;  %v4392_v19 = vunpack.i.h.bf16 %v5046_v1 }
  0xcc   :  { %346 = vrot.lane.b32.xlu1 %v4682_v16, %s4549_s27 }
  0xcd   :  { %v279_v29 = vsel %vm276_vm15, %v4382_v27, %v4387_v33 }
  0xce   :  { %v490_v39 = vsel %vm439_vm2, %v4890_v63, %v279_v29  ;;  %4489 = vrot.lane.b32.xlu0 %v4488_v12, %s4553_s8  ;;  %v5073_v57 = vpop.permute.xlu1 %4394  ;;  %v580_v55 = vpop.permute.xlu0 %579  ;;  %v603_v63 = vsel %vm460_vm6, %v596_v52, %v566_v40 }
  0xcf   :  { %v4397_v21 = vunpack.i.h.bf16 %v5073_v57  ;;  %v581_v53 = vsel %vm204_vm9, %v4969_v34, %v580_v55  ;;  %v610_v60 = vsel %vm5731_vm10, %v603_v63, %v576_v7  ;;  %v618_v61 = vsel %vm474_vm11, %v611_v50, %v580_v55 }
  0xd0   :  { %394 = vrot.lane.b32.xlu1 %v4682_v16, %s4551_s29  ;;  %v617_v11 = vsel %vm474_vm11, %v610_v60, %v581_v53  ;;  %v4555_v7 = vmov 0   ;;  %vm5729_vm9 = vcmask 687104   ;;  %s4568_s29 = smov 74  }
  0xd1   :  { %v303_v17 = vsel %vm300_vm0, %v4392_v19, %v4397_v21  ;;  %4508 = vset.pattern.permute.xlu1 %v4555_v7  ;;  %4509 = vset.pattern.permute.xlu0 %v4555_v7 }
  0xd2   :  { %v5092_v15 = vsel %vm446_vm3, %v490_v39, %v303_v17  ;;  %4494 = vrot.lane.b32.xlu0 %v4493_v36, %s4552_s30  ;;  %v585_v16 = vpop.permute.xlu1 %584  ;;  %v5096_v32 = vpop.permute.xlu0 %4399 }
  0xd3   :  { %v586_v37 = vsel %vm228_vm12, %v4982_v38, %v585_v16  ;;  %v625_v24 = vsel %vm5724_vm13, %v618_v61, %v585_v16  ;;  %v4381_v61 = vunpack.i.l.bf16 %v5015_v56  ;;  %v4386_v16 = vunpack.i.l.bf16 %v5048_v8 }
  0xd4   :  { %v624_v28 = vsel %vm5724_vm13, %v617_v11, %v586_v37  ;;  %v4391_v11 = vunpack.i.l.bf16 %v5046_v1  ;;  %vm5725_vm12 = vcmask 556032  }
  0xd5   :  { %v4498_v13 = vpack.i.bf16 %v625_v24, %v624_v28 }
  0xd6   :  { %v313_v35 = vpop.permute.xlu1 %312  ;;  %v5103_v10 = vpop.permute.xlu0 %4404 }
  0xd7   :  { %v4407_v12 = vunpack.i.h.bf16 %v5103_v10  ;;  %v4406_v23 = vunpack.i.l.bf16 %v5103_v10  ;;  %4499 = vrot.lane.b32.xlu1 %v4498_v13, %s4553_s8  ;;  %v4401_v13 = vunpack.i.l.bf16 %v5096_v32 }
  0xd9   :  { %v158_v29 = vsel %vm156_vm1, %v4406_v23, %v4407_v12 }
  0xda   :  { %v590_v36 = vpop.permute.xlu1 %589  ;;  %v5111_v40 = vpop.permute.xlu0 %4409  ;;  %v462_v52 = vsel %vm460_vm6, %v4817_v14, %v158_v29 }
  0xdb   :  { %v591_v39 = vsel %vm252_vm14, %v4959_v20, %v590_v36  ;;  %v469_v55 = vsel %vm5731_vm10, %v462_v52, %v4810_v6  ;;  %684 = vperm.xlu1 %4508, %v681_v43   ;;  %v4411_v29 = vunpack.i.l.bf16 %v5111_v40  ;;  %vm5730_vm14 = vcmask 547840  }
  0xdc   :  { %v4503_v53 = vpack.i.bf16 %v590_v36, %v591_v39  ;;  %v476_v63 = vsel %vm474_vm11, %v469_v55, %v4835_v26  ;;  %v278_v36 = vsel %vm276_vm15, %v4381_v61, %v4382_v27  ;;  %v325_v27 = vsel %vm324_vm4, %v313_v35, %v4401_v13 }
  0xdd   :  { %v5126_v14 = vsel %vm5724_vm13, %v476_v63, %v4860_v44  ;;  %v4396_v44 = vunpack.i.l.bf16 %v5073_v57  ;;  %v489_v1 = vsel %vm439_vm2, %v4885_v62, %v278_v36 }
  0xde   :  { %v337_v50 = vpop.permute.xlu1 %336  ;;  %v145_v17 = vpop.permute.xlu0 %144  ;;  %4504 = vrot.lane.b32.xlu0 %v4503_v53, %s4553_s8  ;;  %s4569_s8 = smov 112  }
  0xdf   :  { %v157_v60 = vsel %vm156_vm1, %v145_v17, %v4406_v23  ;;  %v301_v39 = vsel %vm300_vm0, %v4396_v44, %v4391_v11 }
  0xe0   :  { %v461_v6 = vsel %vm460_vm6, %v4803_v3, %v157_v60  ;;  %v4402_v3 = vunpack.i.h.bf16 %v5096_v32  ;;  %v349_v60 = vsel %vm5732_vm7, %v337_v50, %v4411_v29 }
  0xe1   :  { %v468_v26 = vsel %vm5731_vm10, %v461_v6, %v4832_v25  ;;  %v4412_v25 = vunpack.i.h.bf16 %v5111_v40 }
  0xe2   :  { %v5138_v37 = vpop.permute.xlu0 %4414  ;;  %v361_v24 = vpop.permute.xlu1 %360  ;;  %v475_v28 = vsel %vm474_vm11, %v468_v26, %v4845_v31  ;;  %v277_v31 = vsel %vm276_vm15, %v4386_v16, %v4381_v61  ;;  %v326_v56 = vsel %vm324_vm4, %v4401_v13, %v4402_v3 }
  0xe3   :  { %v482_v23 = vsel %vm5724_vm13, %v475_v28, %v4870_v48  ;;  %v4417_v52 = vunpack.i.h.bf16 %v5138_v37  ;;  %v4416_v43 = vunpack.i.l.bf16 %v5138_v37  ;;  %v302_v48 = vsel %vm300_vm0, %v4391_v11, %v4392_v19 }
  0xe4   :  { %v488_v19 = vsel %vm439_vm2, %v4893_v0, %v277_v31  ;;  %v350_v17 = vsel %vm5732_vm7, %v4411_v29, %v4412_v25  ;;  %v495_v6 = vsel %vm446_vm3, %v489_v1, %v302_v48 }
  0xe5   :  { %v494_v35 = vsel %vm446_vm3, %v488_v19, %v301_v39  ;;  %v373_v61 = vsel %vm5728_vm8, %v361_v24, %v4416_v43  ;;  %v374_v16 = vsel %vm5728_vm8, %v4416_v43, %v4417_v52  ;;  %v501_v44 = vsel %vm453_vm5, %v495_v6, %v326_v56 }
  0xe6   :  { %v5158_v55 = vpop.permute.xlu0 %4419  ;;  %v385_v7 = vpop.permute.xlu1 %384  ;;  %v500_v62 = vsel %vm453_vm5, %v494_v35, %v325_v27  ;;  %v507_v29 = vsel %vm460_vm6, %v501_v44, %v350_v17 }
  0xe7   :  { %v4422_v53 = vunpack.i.h.bf16 %v5158_v55  ;;  %v4421_v63 = vunpack.i.l.bf16 %v5158_v55  ;;  %v506_v28 = vsel %vm460_vm6, %v500_v62, %v349_v60  ;;  %v513_v31 = vsel %vm5731_vm10, %v507_v29, %v374_v16 }
  0xe8   :  { %v512_v36 = vsel %vm5731_vm10, %v506_v28, %v373_v61 }
  0xe9   :  { %v397_v0 = vsel %vm5729_vm9, %v385_v7, %v4421_v63  ;;  %v398_v50 = vsel %vm5729_vm9, %v4421_v63, %v4422_v53 }
  0xea   :  { %v5182_v26 = vpop.permute.xlu0 %4424  ;;  %v413_v11 = vpop.permute.xlu1 %412  ;;  %v518_v43 = vsel %vm474_vm11, %v512_v36, %v397_v0  ;;  %v519_v7 = vsel %vm474_vm11, %v513_v31, %v398_v50 }
  0xeb   :  { %v4427_v24 = vunpack.i.h.bf16 %v5182_v26  ;;  %v4426_v13 = vunpack.i.l.bf16 %v5182_v26 }
  0xed   :  { %v427_v48 = vsel %vm5725_vm12, %v413_v11, %v4426_v13  ;;  %v428_v39 = vsel %vm5725_vm12, %v4426_v13, %v4427_v24 }
  0xee   :  { %v525_v56 = vsel %vm5724_vm13, %v519_v7, %v428_v39  ;;  %v524_v27 = vsel %vm5724_vm13, %v518_v43, %v427_v48  ;;  %vm5726_vm13 = vmmov 1   ;;  %v5245_v7 = vld [vmem:[%s5717_s1] sm:$0x3f]  ;;  %s4576_s1 = smov 103  }
  0xef   :  { %v3995_v63 = vpack.c.bf16 %v525_v56, %v5126_v14  ;;  %v3997_v1 = vpack.c.bf16 %v524_v27, %v482_v23  ;;  %vm5219_vm12 = vmpackc.low %vm439_vm2, %vm5726_vm13  ;;  %vm5727_vm13 = vcmask 203776  }
  0xf1   :  { %3996 = vmatprep.subr.bf16.mxu1 %v3995_v63 }
  0xf2   :  { %3998 = vmatpush1.bf16.msra.mxu1 %v3997_v1 }
 0x120   :  { %v5203_v19 = vpop.permute.xlu0 %4434 }
 0x121   :  { %v4437_v17 = vunpack.i.h.bf16 %v5203_v19  ;;  %v4436_v60 = vunpack.i.l.bf16 %v5203_v19 }
 0x122   :  { %v5207_v6 = vpop.permute.xlu1 %4429 }
 0x123   :  { %v4432_v35 = vunpack.i.h.bf16 %v5207_v6  ;;  %v4431_v61 = vunpack.i.l.bf16 %v5207_v6  ;;  %v663_v14 = vsel %vm5730_vm14, %v4436_v60, %v4437_v17 }
 0x124   :  { %v4440_v16 = vpop.permute.xlu0 %4439 }
 0x125   :  { %v669_v23 = vsel %vm5730_vm14, %v4431_v61, %v4432_v35  ;;  %v4442_v62 = vunpack.i.h.bf16 %v4440_v16  ;;  %v4441_v0 = vunpack.i.l.bf16 %v4440_v16 }
 0x126   :  { %v5223_v50 = vpop.permute.xlu1 %4444  ;;  %v3999_v44 = vpack.c.bf16 %v669_v23, %v663_v14 }
 0x127   :  { %v668_v28 = vsel %vm5730_vm14, %v4442_v62, %v4431_v61  ;;  %v662_v13 = vsel %vm5730_vm14, %v4441_v0, %v4436_v60  ;;  %v4446_v29 = vunpack.i.l.bf16 %v5223_v50 }
 0x128   :  { %v4002_v36 = vpack.c.bf16 %v668_v28, %v662_v13  ;;  %v5228_v31 = vpop.permute.xlu0 %4449  ;;  %4001 = vmatprep.subr.msk.bf16.mxu1 %vm5219_vm12, %v3999_v44 }
 0x129   :  { %v280_v43 = vsel %vm276_vm15, %v4387_v33, %v4446_v29  ;;  %v4451_v48 = vunpack.i.l.bf16 %v5228_v31 }
 0x12a   :  { %4004 = vmatpush1.bf16.msk.msra.mxu1 %vm5219_vm12, %v4002_v36  ;;  %v5240_v39 = vpop.permute.xlu1 %4454  ;;  %v491_v56 = vsel %vm439_vm2, %v4988_v51, %v280_v43 }
 0x12b   :  { %v304_v8 = vsel %vm300_vm0, %v4397_v21, %v4451_v48  ;;  %v4457_v33 = vunpack.i.h.bf16 %v5240_v39  ;;  %v4456_v27 = vunpack.i.l.bf16 %v5240_v39 }
 0x12c   :  { %v4460_v63 = vpop.permute.xlu0 %4459  ;;  %v497_v57 = vsel %vm446_vm3, %v491_v56, %v304_v8 }
 0x12d   :  { %v327_v1 = vsel %vm324_vm4, %v4402_v3, %v4456_v27  ;;  %v328_v60 = vsel %vm324_vm4, %v4456_v27, %v4457_v33  ;;  %v4462_v51 = vunpack.i.h.bf16 %v4460_v63  ;;  %v4461_v61 = vunpack.i.l.bf16 %v4460_v63  ;;  %3595 = vmatmul.mubr.msk.f32.vlgmr.msra.gmra.mrb[0].mxu1 %vm5727_vm13, %v5245_v7 }
 0x12e   :  { %v5265_v21 = vpop.permute.xlu1 %4464  ;;  %838 = vmatprep.mubr.f32.mxu1 %v4554_v9  ;;  %v502_v23 = vsel %vm453_vm5, %v5092_v15, %v327_v1  ;;  %v503_v62 = vsel %vm453_vm5, %v497_v57, %v328_v60  ;;  %vm5735_vm13 = vcmask 556032  }
 0x12f   :  { %v159_v32 = vsel %vm156_vm1, %v4407_v12, %v4461_v61  ;;  %v160_v3 = vsel %vm156_vm1, %v4461_v61, %v4462_v51  ;;  %v4467_v16 = vunpack.i.h.bf16 %v5265_v21  ;;  %v4466_v14 = vunpack.i.l.bf16 %v5265_v21 }
 0x130   :  { %v463_v0 = vsel %vm460_vm6, %v4820_v18, %v159_v32  ;;  %v464_v44 = vsel %vm460_vm6, %v4967_v46, %v160_v3  ;;  %v5281_v10 = vpop.permute.xlu0 %4469 }
 0x131   :  { %v470_v12 = vsel %vm5731_vm10, %v463_v0, %v4829_v22  ;;  %v351_v28 = vsel %vm5732_vm7, %v4412_v25, %v4466_v14  ;;  %v352_v13 = vsel %vm5732_vm7, %v4466_v14, %v4467_v16  ;;  %v4472_v15 = vunpack.i.h.bf16 %v5281_v10 }
 0x132   :  { %v508_v36 = vsel %vm460_vm6, %v502_v23, %v351_v28  ;;  %v509_v18 = vsel %vm460_vm6, %v503_v62, %v352_v13  ;;  %v4471_v43 = vunpack.i.l.bf16 %v5281_v10  ;;  %v5293_v46 = vpop.permute.xlu1 %4474  ;;  %v471_v56 = vsel %vm5731_vm10, %v464_v44, %v4976_v42 }
 0x133   :  { %v4447_v22 = vunpack.i.h.bf16 %v5223_v50  ;;  %v4477_v40 = vunpack.i.h.bf16 %v5293_v46  ;;  %v4476_v25 = vunpack.i.l.bf16 %v5293_v46  ;;  %v478_v1 = vsel %vm474_vm11, %v471_v56, %v4997_v2 }
 0x134   :  { %v375_v8 = vsel %vm5728_vm8, %v4417_v52, %v4471_v43  ;;  %v376_v27 = vsel %vm5728_vm8, %v4471_v43, %v4472_v15  ;;  %v5304_v63 = vpop.permute.xlu0 %4479  ;;  %v477_v42 = vsel %vm474_vm11, %v470_v12, %v4842_v30  ;;  %v4452_v30 = vunpack.i.h.bf16 %v5228_v31  ;;  %vm5736_vm8 = vmmov %vm5735_vm13 }
 0x135   :  { %v514_v60 = vsel %vm5731_vm10, %v508_v36, %v375_v8  ;;  %v515_v61 = vsel %vm5731_vm10, %v509_v18, %v376_v27  ;;  %v399_v37 = vsel %vm5729_vm9, %v4422_v53, %v4476_v25  ;;  %v400_v52 = vsel %vm5729_vm9, %v4476_v25, %v4477_v40 }
 0x136   :  { %v520_v57 = vsel %vm474_vm11, %v514_v60, %v399_v37  ;;  %v4482_v21 = vunpack.i.h.bf16 %v5304_v63  ;;  %v4481_v32 = vunpack.i.l.bf16 %v5304_v63  ;;  %v323_v2 = vpop.permute.xlu1 %322  ;;  %v521_v3 = vsel %vm474_vm11, %v515_v61, %v400_v52 }
 0x137   :  { %vm5737_vm9 = vcmask 1046528   ;;  %v281_v10 = vsel %vm276_vm15, %v4446_v29, %v4447_v22  ;;  %v493_v28 = vsel %vm439_vm2, %v4959_v20, %v4447_v22  ;;  %v329_v29 = vsel %vm324_vm4, %v4457_v33, %v323_v2 }
 0x138   :  { %v429_v14 = vsel %vm5735_vm13, %v4427_v24, %v4481_v32  ;;  %v430_v55 = vsel %vm5736_vm8, %v4481_v32, %v4482_v21  ;;  %v155_v53 = vpop.permute.xlu0 %154  ;;  %v485_v23 = vsel %vm5737_vm9, %v478_v1, %v5022_v58  ;;  %vm5738_vm14 = vmmov %vm5737_vm9  ;;  %v492_v50 = vsel %vm439_vm2, %v4992_v54, %v281_v10  ;;  %v939_v10 = vld [vmem:[#allocation2 + $0x88] sm:$0xff] }
 0x139   :  { %v527_v62 = vsel %vm5738_vm14, %v521_v3, %v430_v55  ;;  %vm5739_vm10 = vmmov %vm5737_vm9  ;;  %v161_v58 = vsel %vm156_vm1, %v4462_v51, %v155_v53  ;;  %v466_v36 = vsel %vm460_vm6, %v4923_v41, %v155_v53  ;;  %v499_v31 = vsel %vm446_vm3, %v493_v28, %v4452_v30 }
 0x13a   :  { %v484_v0 = vsel %vm5739_vm10, %v477_v42, %v4865_v45  ;;  %vm5740_vm7 = vmmov %vm5737_vm9  ;;  %v5334_v26 = vpop.permute.xlu1 %4484  ;;  %v4005_v24 = vpack.c.bf16 %v527_v62, %v485_v23  ;;  %v305_v45 = vsel %vm300_vm0, %v4451_v48, %v4452_v30  ;;  %v465_v48 = vsel %vm460_vm6, %v4954_v4, %v161_v58 }
 0x13b   :  { %v526_v44 = vsel %vm5740_vm7, %v520_v57, %v429_v14  ;;  %v4487_v20 = vunpack.i.h.bf16 %v5334_v26  ;;  %v4486_v51 = vunpack.i.l.bf16 %v5334_v26  ;;  %v498_v54 = vsel %vm446_vm3, %v492_v50, %v305_v45  ;;  %v923_v45 = vld [vmem:[#allocation2 + $0x8] sm:$0xff]  ;;  %v940_v50 = vld [vmem:[#allocation2 + $0x90] sm:$0xff] }
 0x13c   :  { %v4007_v12 = vpack.c.bf16 %v526_v44, %v484_v0  ;;  %4006 = vmatprep.subr.bf16.mxu1 %v4005_v24  ;;  %v371_v13 = vpop.permute.xlu0 %370  ;;  %v505_v43 = vsel %vm453_vm5, %v499_v31, %v323_v2  ;;  %vm5741_vm2 = vcmask 703488   ;;  %v504_v46 = vsel %vm453_vm5, %v498_v54, %v329_v29  ;;  %v938_v44 = vld [vmem:[#allocation2 + $0x80] sm:$0xff]  ;;  %v941_v29 = vld [vmem:[#allocation2 + $0x98] sm:$0xff] }
 0x13d   :  { %vm5742_vm10 = vcmask 1044480   ;;  %vm5744_vm15 = vcmask 547840   ;;  %vm5746_vm0 = vcmask 695296   ;;  %vm5749_vm4 = vcmask 687104   ;;  %v942_v31 = vld [vmem:[#allocation2 + $0xa0] sm:$0xff] }
 0x13e   :  { %4008 = vmatpush1.bf16.msra.mxu1 %v4007_v12  ;;  %v347_v18 = vpop.permute.xlu1 %346  ;;  %v473_v41 = vsel %vm5742_vm10, %v466_v36, %v4956_v5  ;;  %vm5743_vm13 = vmmov %vm5742_vm10  ;;  %v670_v4 = vsel %vm5744_vm15, %v4432_v35, %v4486_v51  ;;  %v377_v27 = vsel %vm5746_vm0, %v4472_v15, %v371_v13  ;;  %vm5752_vm9 = vcmask 556032  }
 0x13f   :  { %v353_v39 = vsel %vm5741_vm2, %v4467_v16, %v347_v18  ;;  %v472_v25 = vsel %vm5743_vm13, %v465_v48, %v4980_v47  ;;  %vm5745_vm3 = vmmov %vm5744_vm15  ;;  %v511_v1 = vsel %vm460_vm6, %v505_v43, %v347_v18  ;;  %v480_v15 = vsel %vm474_vm11, %v473_v41, %v4969_v34  ;;  %v924_v18 = vld [vmem:[#allocation2 + $0x10] sm:$0xff]  ;;  %v943_v48 = vld [vmem:[#allocation2 + $0xa8] sm:$0xff] }
 0x140   :  { %v4490_v33 = vpop.permute.xlu0 %4489  ;;  %v671_v8 = vsel %vm5745_vm3, %v4486_v51, %v4487_v20  ;;  %v510_v63 = vsel %vm460_vm6, %v504_v46, %v353_v39  ;;  %vm5747_vm5 = vmmov %vm5745_vm3  ;;  %v479_v61 = vsel %vm474_vm11, %v472_v25, %v5005_v49  ;;  %vm5754_vm2 = vcmask 1046528   ;;  %v926_v39 = vld [vmem:[#allocation2 + $0x20] sm:$0xff]  ;;  %v944_v46 = vld [vmem:[#allocation2 + $0xb0] sm:$0xff] }
 0x141   :  { %v4492_v56 = vunpack.i.h.bf16 %v4490_v33  ;;  %v4491_v22 = vunpack.i.l.bf16 %v4490_v33  ;;  %vm5748_vm1 = vmmov %vm5745_vm3  ;;  %v487_v34 = vsel %vm5754_vm2, %v480_v15, %v4982_v38  ;;  %vm5758_vm3 = vcmask 203776   ;;  %v927_v33 = vld [vmem:[#allocation2 + $0x28] sm:$0xff]  ;;  %v945_v41 = vld [vmem:[#allocation2 + $0xb8] sm:$0xff] }
 0x142   :  { %v395_v16 = vpop.permute.xlu1 %394  ;;  %vm5750_vm7 = vmmov %vm5742_vm10  ;;  %v4029_v51 = vpack.c.bf16 %v941_v29, %v940_v50  ;;  %v4033_v43 = vpack.c.bf16 %v943_v48, %v942_v31  ;;  %v4035_v11 = vpack.c.bf16 %v927_v33, %v926_v39  ;;  %v929_v25 = vld [vmem:[#allocation2 + $0x38] sm:$0xff]  ;;  %v960_v29 = vld [vmem:[#allocation2 + $0x130] sm:$0xff] }
 0x143   :  { %v664_v5 = vsel %vm5747_vm5, %v4437_v17, %v4491_v22  ;;  %v665_v42 = vsel %vm5748_vm1, %v4491_v22, %v4492_v56  ;;  %v401_v6 = vsel %vm5749_vm4, %v4477_v40, %v395_v16  ;;  %v516_v57 = vsel %vm5750_vm7, %v510_v63, %v377_v27  ;;  %vm5751_vm8 = vmmov %vm5750_vm7  ;;  %v928_v22 = vld [vmem:[#allocation2 + $0x30] sm:$0xff]  ;;  %v931_v63 = vld [vmem:[#allocation2 + $0x48] sm:$0xff] }
 0x144   :  { %v4009_v47 = vpack.c.bf16 %v671_v8, %v665_v42  ;;  %v4012_v60 = vpack.c.bf16 %v670_v4, %v664_v5  ;;  %v4495_v35 = vpop.permute.xlu0 %4494  ;;  %v517_v19 = vsel %vm5751_vm8, %v511_v1, %v371_v13  ;;  %v522_v17 = vsel %vm474_vm11, %v516_v57, %v401_v6  ;;  %vm5753_vm14 = vmmov %vm5752_vm9  ;;  %v922_v13 = vld [vmem:[#allocation2] sm:$0xff]  ;;  %v947_v8 = vld [vmem:[#allocation2 + $0xc8] sm:$0xff] }
 0x145   :  { %v4497_v37 = vunpack.i.h.bf16 %v4495_v35  ;;  %v4496_v52 = vunpack.i.l.bf16 %v4495_v35  ;;  %v523_v40 = vsel %vm474_vm11, %v517_v19, %v395_v16  ;;  %vm5755_vm10 = vmmov %vm5754_vm2  ;;  %v4027_v36 = vpack.c.bf16 %v923_v45, %v922_v13  ;;  %v946_v4 = vld [vmem:[#allocation2 + $0xc0] sm:$0xff]  ;;  %v948_v1 = vld [vmem:[#allocation2 + $0xd0] sm:$0xff] }
 0x146   :  { %4011 = vmatprep.subr.msk.bf16.mxu1 %vm5219_vm12, %v4009_v47  ;;  %vm5756_vm13 = vmmov %vm5754_vm2  ;;  %v4039_v27 = vpack.c.bf16 %v929_v25, %v928_v22  ;;  %v930_v16 = vld [vmem:[#allocation2 + $0x40] sm:$0xff]  ;;  %v949_v5 = vld [vmem:[#allocation2 + $0xd8] sm:$0xff]  ;;  %vm5764_vm8 = vmmov 1  }
 0x147   :  { %v431_v32 = vsel %vm5752_vm9, %v4482_v21, %v4496_v52  ;;  %v432_v49 = vsel %vm5753_vm14, %v4496_v52, %v4497_v37  ;;  %4014 = vmatpush1.bf16.msk.msra.mxu1 %vm5219_vm12, %v4012_v60  ;;  %v486_v3 = vsel %vm5756_vm13, %v479_v61, %v5026_v59  ;;  %vm5757_vm15 = vmmov %vm5754_vm2  ;;  %v4043_v42 = vpack.c.bf16 %v931_v63, %v930_v16  ;;  %v932_v60 = vld [vmem:[#allocation2 + $0x50] sm:$0xff]  ;;  %v933_v6 = vld [vmem:[#allocation2 + $0x58] sm:$0xff] }
 0x148   :  { %v529_v2 = vsel %vm5755_vm10, %v523_v40, %v432_v49  ;;  %v528_v30 = vsel %vm5757_vm15, %v522_v17, %v431_v32  ;;  %vm5759_vm0 = vmmov %vm5748_vm1  ;;  %v4045_v47 = vpack.c.bf16 %v949_v5, %v948_v1  ;;  %v950_v35 = vld [vmem:[#allocation2 + $0xe0] sm:$0xff]  ;;  %v951_v61 = vld [vmem:[#allocation2 + $0xe8] sm:$0xff]  ;;  %v4047_v15 = vpack.c.bf16 %v933_v6, %v932_v60 }
 0x149   :  { %v4015_v14 = vpack.c.bf16 %v529_v2, %v487_v34  ;;  %v4017_v55 = vpack.c.bf16 %v528_v30, %v486_v3  ;;  %v4500_v21 = vpop.permute.xlu1 %4499  ;;  %vm5760_vm5 = vmmov %vm5759_vm0  ;;  %v4049_v37 = vpack.c.bf16 %v951_v61, %v950_v35  ;;  %v934_v52 = vld [vmem:[#allocation2 + $0x60] sm:$0xff]  ;;  %v935_v57 = vld [vmem:[#allocation2 + $0x68] sm:$0xff]  ;;  %vm3106_vm14 = vcmask 15360  }
 0x14a   :  { %3598 = vmatmul.mubr.msk.f32.vlgmr.msra.gmra.mrb[2].mxu1 %vm5758_vm3, %v5245_v7  ;;  %v4502_v53 = vunpack.i.h.bf16 %v4500_v21  ;;  %v4501_v23 = vunpack.i.l.bf16 %v4500_v21  ;;  %vm5761_vm1 = vmmov %vm5759_vm0  ;;  %v4051_v19 = vpack.c.bf16 %v935_v57, %v934_v52  ;;  %v952_v17 = vld [vmem:[#allocation2 + $0xf0] sm:$0xff]  ;;  %v953_v40 = vld [vmem:[#allocation2 + $0xf8] sm:$0xff]  ;;  %vm3574_vm2 = vcmask 31744  }
 0x14b   :  { %4016 = vmatprep.subr.bf16.mxu1 %v4015_v14  ;;  %909 = vmatprep.mubr.f32.mxu1 %v4554_v9  ;;  %vm5762_vm4 = vmmov %vm5759_vm0  ;;  %v4025_v9 = vpack.c.bf16 %v939_v10, %v938_v44  ;;  %v4053_v32 = vpack.c.bf16 %v953_v40, %v952_v17  ;;  %v936_v49 = vld [vmem:[#allocation2 + $0x70] sm:$0xff]  ;;  %v937_v34 = vld [vmem:[#allocation2 + $0x78] sm:$0xff] }
 0x14c   :  { %4018 = vmatpush1.bf16.msra.mxu1 %v4017_v55  ;;  %v666_v59 = vsel %vm5759_vm0, %v4492_v56, %v4501_v23  ;;  %v667_v26 = vsel %vm5760_vm5, %v4501_v23, %v4502_v53  ;;  %vm5763_vm7 = vmmov %vm5758_vm3  ;;  %v4037_v56 = vpack.c.bf16 %v945_v41, %v944_v46  ;;  %v4055_v2 = vpack.c.bf16 %v937_v34, %v936_v49  ;;  %v970_v3 = vld [vmem:[#allocation2 + $0x180] sm:$0xff]  ;;  %v971_v30 = vld [vmem:[#allocation2 + $0x188] sm:$0xff] }
 0x14d   :  { %v4057_v14 = vpack.c.bf16 %v971_v30, %v970_v3  ;;  %v954_v55 = vld [vmem:[#allocation2 + $0x100] sm:$0xff]  ;;  %v955_v21 = vld [vmem:[#allocation2 + $0x108] sm:$0xff]  ;;  %v4557_v23 = vmov 0.0|0.0   ;;  %v956_v44 = vld [vmem:[#allocation2 + $0x110] sm:$0xff] }
 0x14e   :  { %v4059_v53 = vpack.c.bf16 %v955_v21, %v954_v55  ;;  %v957_v10 = vld [vmem:[#allocation2 + $0x118] sm:$0xff]  ;;  %v976_v13 = vld [vmem:[#allocation2 + $0x1b0] sm:$0xff]  ;;  %v962_v48 = vld [vmem:[#allocation2 + $0x140] sm:$0xff] }
 0x14f   :  { %4058 = vmatprep.subr.bf16.mxu0 %v4057_v14  ;;  %v977_v45 = vld [vmem:[#allocation2 + $0x1b8] sm:$0xff]  ;;  %v980_v39 = vld [vmem:[#allocation2 + $0x1d0] sm:$0xff]  ;;  %v982_v22 = vld [vmem:[#allocation2 + $0x1e0] sm:$0xff] }
 0x150   :  { %v4505_v38 = vpop.permute.xlu0 %4504  ;;  %4060 = vmatpush3.bf16.msra.mxu0 %v4059_v53  ;;  %v4069_v50 = vpack.c.bf16 %v977_v45, %v976_v13  ;;  %v981_v33 = vld [vmem:[#allocation2 + $0x1d8] sm:$0xff]  ;;  %v964_v41 = vld [vmem:[#allocation2 + $0x150] sm:$0xff]  ;;  %v983_v25 = vld [vmem:[#allocation2 + $0x1e8] sm:$0xff] }
 0x151   :  { %v4507_v62 = vunpack.i.h.bf16 %v4505_v38  ;;  %v4506_v0 = vunpack.i.l.bf16 %v4505_v38  ;;  %v972_v38 = vld [vmem:[#allocation2 + $0x190] sm:$0xff]  ;;  %v4077_v46 = vpack.c.bf16 %v981_v33, %v980_v39  ;;  %v985_v63 = vld [vmem:[#allocation2 + $0x1f8] sm:$0xff]  ;;  %v990_v34 = vld [vmem:[#allocation2 + $0x220] sm:$0xff] }
 0x152   :  { %v984_v16 = vld [vmem:[#allocation2 + $0x1f0] sm:$0xff]  ;;  %v993_v14 = vld [vmem:[#allocation2 + $0x238] sm:$0xff]  ;;  %v994_v21 = vld [vmem:[#allocation2 + $0x240] sm:$0xff] }
 0x153   :  { %v672_v24 = vsel %vm5761_vm1, %v4487_v20, %v4506_v0  ;;  %v673_v12 = vsel %vm5762_vm4, %v4506_v0, %v4507_v62  ;;  %v925_v20 = vld [vmem:[#allocation2 + $0x18] sm:$0xff]  ;;  %v4085_v1 = vpack.c.bf16 %v985_v63, %v984_v16  ;;  %v968_v5 = vld [vmem:[#allocation2 + $0x170] sm:$0xff]  ;;  %v995_v53 = vld [vmem:[#allocation2 + $0x248] sm:$0xff] }
 0x154   :  { %v4019_v28 = vpack.c.bf16 %v673_v12, %v667_v26  ;;  %v4022_v58 = vpack.c.bf16 %v672_v24, %v666_v59  ;;  %v4031_v54 = vpack.c.bf16 %v925_v20, %v924_v18  ;;  %v973_v62 = vld [vmem:[#allocation2 + $0x198] sm:$0xff]  ;;  %v4063_v59 = vpack.c.bf16 %v957_v10, %v956_v44  ;;  %v974_v26 = vld [vmem:[#allocation2 + $0x1a0] sm:$0xff]  ;;  %v975_v24 = vld [vmem:[#allocation2 + $0x1a8] sm:$0xff] }
 0x155   :  { %v4061_v0 = vpack.c.bf16 %v973_v62, %v972_v38  ;;  %v4065_v12 = vpack.c.bf16 %v975_v24, %v974_v26  ;;  %v978_v18 = vld [vmem:[#allocation2 + $0x1c0] sm:$0xff]  ;;  %v979_v20 = vld [vmem:[#allocation2 + $0x1c8] sm:$0xff]  ;;  %v988_v40 = vld [vmem:[#allocation2 + $0x210] sm:$0xff]  ;;  %v4102_v38 = vpack.c.bf16 %v995_v53, %v994_v21 }
 0x156   :  { %4021 = vmatprep.subr.msk.bf16.mxu1 %vm5219_vm12, %v4019_v28  ;;  %v958_v28 = vld [vmem:[#allocation2 + $0x120] sm:$0xff]  ;;  %v4073_v31 = vpack.c.bf16 %v979_v20, %v978_v18  ;;  %v992_v30 = vld [vmem:[#allocation2 + $0x230] sm:$0xff]  ;;  %vm5430_vm9 = vmpackc.low %vm460_vm6, %vm5764_vm8  ;;  %vm1242_vm6 = vcmask 48128  }
 0x157   :  { %4024 = vmatpush1.bf16.msk.msra.mxu1 %vm5219_vm12, %v4022_v58  ;;  %4062 = vmatprep.subr.bf16.mxu0 %v4061_v0  ;;  %v959_v58 = vld [vmem:[#allocation2 + $0x128] sm:$0xff]  ;;  %v4099_v55 = vpack.c.bf16 %v993_v14, %v992_v30  ;;  %v996_v62 = vld [vmem:[#allocation2 + $0x250] sm:$0xff]  ;;  %v997_v0 = vld [vmem:[#allocation2 + $0x258] sm:$0xff]  ;;  %vm1012_vm12 = vcmask 621568  }
 0x158   :  { %4026 = vmatprep.subr.bf16.mxu1 %v4025_v9  ;;  %4064 = vmatpush3.bf16.msra.mxu0 %v4063_v59  ;;  %v4067_v9 = vpack.c.bf16 %v959_v58, %v958_v28  ;;  %v4105_v44 = vpack.c.bf16 %v997_v0, %v996_v62  ;;  %v998_v10 = vld [vmem:[#allocation2 + $0x260] sm:$0xff]  ;;  %v999_v59 = vld [vmem:[#allocation2 + $0x268] sm:$0xff]  ;;  %v1001_v28 = vld [vmem:[#allocation2 + $0x278] sm:$0xff] }
 0x159   :  { %4066 = vmatprep.subr.bf16.mxu0 %v4065_v12  ;;  %v4108_v26 = vpack.c.bf16 %v999_v59, %v998_v10  ;;  %v1000_v12 = vld [vmem:[#allocation2 + $0x270] sm:$0xff] }
 0x15a   :  { %3601 = vmatmul.mubr.msk.f32.vlgmr.msra.gmra.mrb[4].mxu1 %vm5763_vm7, %v5245_v7  ;;  %v4041_v7 = vpack.c.bf16 %v947_v8, %v946_v4  ;;  %v4081_v4 = vpack.c.bf16 %v983_v25, %v982_v22  ;;  %v966_v8 = vld [vmem:[#allocation2 + $0x160] sm:$0xff]  ;;  %v5408_v60 = vpop.permute.xlu1 %684  ;;  %v4111_v45 = vpack.c.bf16 %v1001_v28, %v1000_v12  ;;  %v1004_v20 = vld [vmem:[#allocation2 + $0x290] sm:$0xff] }
 0x15b   :  { %4028 = vmatpush3.bf16.msra.mxu1 %v4027_v36  ;;  %v961_v36 = vld [vmem:[#allocation2 + $0x138] sm:$0xff] }
 0x15c   :  { %4030 = vmatprep.subr.bf16.mxu1 %v4029_v51  ;;  %4068 = vmatpush3.bf16.msra.mxu0 %v4067_v9  ;;  %v4071_v51 = vpack.c.bf16 %v961_v36, %v960_v29  ;;  %v1002_v29 = vld [vmem:[#allocation2 + $0x280] sm:$0xff]  ;;  %v1003_v36 = vld [vmem:[#allocation2 + $0x288] sm:$0xff] }
 0x15d   :  { %4070 = vmatprep.subr.bf16.mxu0 %v4069_v50  ;;  %v4114_v18 = vpack.c.bf16 %v1003_v36, %v1002_v29 }
 0x15f   :  { %4032 = vmatpush3.bf16.msra.mxu1 %v4031_v54  ;;  %v963_v54 = vld [vmem:[#allocation2 + $0x148] sm:$0xff] }
 0x160   :  { %4034 = vmatprep.subr.bf16.mxu1 %v4033_v43  ;;  %4072 = vmatpush3.bf16.msra.mxu0 %v4071_v51  ;;  %v4075_v43 = vpack.c.bf16 %v963_v54, %v962_v48  ;;  %v1006_v54 = vld [vmem:[#allocation2 + $0x2a0] sm:$0xff] }
 0x161   :  { %4074 = vmatprep.subr.bf16.mxu0 %v4073_v31  ;;  %v1005_v31 = vld [vmem:[#allocation2 + $0x298] sm:$0xff] }
 0x162   :  { %v4117_v48 = vpack.c.bf16 %v1005_v31, %v1004_v20 }
 0x163   :  { %4036 = vmatpush3.bf16.msra.mxu1 %v4035_v11  ;;  %v965_v11 = vld [vmem:[#allocation2 + $0x158] sm:$0xff] }
 0x164   :  { %4038 = vmatprep.subr.bf16.mxu1 %v4037_v56  ;;  %4076 = vmatpush3.bf16.msra.mxu0 %v4075_v43  ;;  %v4079_v56 = vpack.c.bf16 %v965_v11, %v964_v41  ;;  %v1007_v43 = vld [vmem:[#allocation2 + $0x2a8] sm:$0xff]  ;;  %v1009_v41 = vld [vmem:[#allocation2 + $0x2b8] sm:$0xff] }
 0x165   :  { %4078 = vmatprep.subr.bf16.mxu0 %v4077_v46  ;;  %v4120_v39 = vpack.c.bf16 %v1007_v43, %v1006_v54  ;;  %v1008_v46 = vld [vmem:[#allocation2 + $0x2b0] sm:$0xff]  ;;  %v3461_v43 = vld [vmem:[%s5720_s4] sm:$0xff] }
 0x166   :  { %v4123_v22 = vpack.c.bf16 %v1009_v41, %v1008_v46  ;;  %v3479_v41 = vld [vmem:[%s5722_s6 + $0x10] sm:$0xff] }
 0x167   :  { %4040 = vmatpush3.bf16.msra.mxu1 %v4039_v27  ;;  %v967_v27 = vld [vmem:[#allocation2 + $0x168] sm:$0xff] }
 0x168   :  { %4042 = vmatprep.subr.bf16.mxu1 %v4041_v7  ;;  %4080 = vmatpush3.bf16.msra.mxu0 %v4079_v56  ;;  %v4083_v7 = vpack.c.bf16 %v967_v27, %v966_v8  ;;  %v1011_v8 = vld [vmem:[#allocation2 + $0x2c8] sm:$0xf] }
 0x169   :  { %4082 = vmatprep.subr.bf16.mxu0 %v4081_v4  ;;  %v1010_v4 = vld [vmem:[#allocation2 + $0x2c0] sm:$0xff] }
 0x16a   :  { %v4126_v27 = vpack.c.bf16 %v1011_v8, %v1010_v4  ;;  %v3482_v4 = vld [vmem:[%s5722_s6 + $0x28] sm:$0xff] }
 0x16b   :  { %4044 = vmatpush3.bf16.msra.mxu1 %v4043_v42  ;;  %v969_v42 = vld [vmem:[#allocation2 + $0x178] sm:$0xff] }
 0x16c   :  { %4046 = vmatprep.subr.bf16.mxu1 %v4045_v47  ;;  %4084 = vmatpush3.bf16.msra.mxu0 %v4083_v7  ;;  %v4087_v47 = vpack.c.bf16 %v969_v42, %v968_v5 }
 0x16d   :  { %4086 = vmatprep.subr.bf16.mxu0 %v4085_v1  ;;  %v5439_v1 = vld [vmem:[%s5719_s3] sm:$0xff] }
 0x16e   :  { %1235 = vrot.lane.b32.xlu1 %v5439_v1, %s4558_s14 }
 0x16f   :  { %4048 = vmatpush3.bf16.msra.mxu1 %v4047_v15  ;;  %v986_v15 = vld [vmem:[#allocation2 + $0x200] sm:$0xff] }
 0x170   :  { %4050 = vmatprep.subr.bf16.mxu1 %v4049_v37  ;;  %4088 = vmatpush3.bf16.msra.mxu0 %v4087_v47  ;;  %v987_v37 = vld [vmem:[#allocation2 + $0x208] sm:$0xff] }
 0x173   :  { %4052 = vmatpush3.bf16.msra.mxu1 %v4051_v19  ;;  %v4090_v19 = vpack.c.bf16 %v987_v37, %v986_v15 }
 0x174   :  { %4054 = vmatprep.subr.bf16.mxu1 %v4053_v32  ;;  %v989_v32 = vld [vmem:[#allocation2 + $0x218] sm:$0xff] }
 0x175   :  { %v4093_v49 = vpack.c.bf16 %v989_v32, %v988_v40 }
 0x177   :  { %4056 = vmatpush3.bf16.msra.mxu1 %v4055_v2  ;;  %v991_v2 = vld [vmem:[#allocation2 + $0x228] sm:$0xff] }
 0x178   :  { %4089 = vmatprep.subr.bf16.mxu1 %v4557_v23  ;;  %v4096_v3 = vpack.c.bf16 %v991_v2, %v990_v34 }
 0x200   :  { %v769_v6 = vpop.f32.mrb[0].mxu1 }
 0x201   :  { %v770_v35 = vadd.f32 %v769_v6, %v5408_v60  ;;  %v771_v61 = vpop.f32.mrb[1].mxu1 }
 0x202   :  { %v772_v52 = vadd.f32 %v771_v61, %v5408_v60  ;;  %v1236_v61 = vpop.permute.xlu1 %1235 }
 0x203   :  { %v916_v17 = vmax.f32 %v770_v35, 0.0 }
 0x204   :  { %v917_v57 = vmax.f32 %v772_v52, 0.0 }
 0x206   :  { %1083 = vmatprep.mubr.f32.mxu1 %v917_v57  ;;  %v5452_v57 = vld [vmem:[%s5719_s3 + $0x10] sm:$0xff] }
 0x207   :  { %1084 = vmatmul.mubr.f32.vlgmr.msra.gmra.mrb[6].mxu1 %v916_v17 }
 0x208   :  { %4091 = vmatpush1.bf16.msra.mxu1 %v4090_v19  ;;  %v1230_v19 = vld [vmem:[%s5719_s3 + $0x8] sm:$0xff] }
 0x209   :  { %4092 = vmatprep.subr.bf16.mxu1 %v4557_v23 }
 0x20c   :  { %4094 = vmatpush1.bf16.msra.mxu1 %v4093_v49 }
 0x20d   :  { %4095 = vmatprep.subr.bf16.mxu1 %v4557_v23 }
 0x210   :  { %4097 = vmatpush1.bf16.msra.mxu1 %v4096_v3  ;;  %v1232_v3 = vld [vmem:[%s5719_s3 + $0x18] sm:$0xff]  ;;  %s4588_s3 = smov 93  }
 0x211   :  { %4098 = vmatprep.subr.bf16.mxu1 %v4557_v23 }
 0x214   :  { %4100 = vmatpush1.bf16.msra.mxu1 %v4099_v55 }
 0x215   :  { %4101 = vmatprep.subr.bf16.mxu1 %v4557_v23 }
 0x218   :  { %4103 = vmatpush1.bf16.msra.mxu1 %v4102_v38 }
 0x219   :  { %4104 = vmatprep.subr.bf16.mxu1 %v4557_v23 }
 0x21c   :  { %4106 = vmatpush1.bf16.msra.mxu1 %v4105_v44  ;;  %v3462_v44 = vld [vmem:[%s5720_s4 + $0x8] sm:$0xff] }
 0x21d   :  { %v840_v24 = vpop.f32.mrb[2].mxu1  ;;  %4107 = vmatprep.subr.bf16.mxu1 %v4557_v23 }
 0x21e   :  { %v841_v58 = vadd.f32 %v840_v24, %v5408_v60  ;;  %v842_v9 = vpop.f32.mrb[3].mxu1 }
 0x21f   :  { %v843_v13 = vadd.f32 %v842_v9, %v5408_v60 }
 0x220   :  { %4109 = vmatpush1.bf16.msra.mxu1 %v4108_v26  ;;  %v918_v51 = vmax.f32 %v841_v58, 0.0 }
 0x221   :  { %4110 = vmatprep.subr.bf16.mxu1 %v4557_v23  ;;  %v919_v50 = vmax.f32 %v843_v13, 0.0 }
 0x223   :  { %1153 = vmatprep.mubr.f32.mxu0 %v919_v50 }
 0x224   :  { %4112 = vmatpush1.bf16.msra.mxu1 %v4111_v45  ;;  %1154 = vmatmul.mubr.f32.vlgmr.msra.gmra.mrb[0].mxu0 %v918_v51 }
 0x225   :  { %4113 = vmatprep.subr.bf16.mxu1 %v4557_v23  ;;  %3845 = vmatprep.mubr.msk.f32.mxu0 %vm1242_vm6, %v1236_v61 }
 0x228   :  { %4115 = vmatpush1.bf16.msra.mxu1 %v4114_v18 }
 0x229   :  { %4116 = vmatprep.subr.bf16.mxu1 %v4557_v23 }
 0x22c   :  { %4118 = vmatpush1.bf16.msra.mxu1 %v4117_v48 }
 0x22d   :  { %v911_v33 = vpop.f32.mrb[4].mxu1  ;;  %4119 = vmatprep.subr.bf16.mxu1 %v4557_v23 }
 0x22e   :  { %v913_v11 = vpop.f32.mrb[5].mxu1  ;;  %v912_v7 = vadd.f32 %v911_v33, %v5408_v60  ;;  %v3478_v33 = vld [vmem:[%s5722_s6 + $0x8] sm:$0xff] }
 0x22f   :  { %v914_v56 = vadd.f32 %v913_v11, %v5408_v60  ;;  %v3480_v11 = vld [vmem:[%s5722_s6 + $0x18] sm:$0xff] }
 0x230   :  { %4121 = vmatpush1.bf16.msra.mxu1 %v4120_v39  ;;  %v920_v63 = vmax.f32 %v912_v7, 0.0  ;;  %v3477_v39 = vld [vmem:[%s5722_s6] sm:$0xff]  ;;  %v3483_v7 = vld [vmem:[%s5722_s6 + $0x30] sm:$0xff] }
 0x231   :  { %v921_v25 = vmax.f32 %v914_v56, 0.0  ;;  %4122 = vmatprep.subr.bf16.mxu1 %v4557_v23  ;;  %v4129_v46 = vpack.c.bf16 %v3478_v33, %v3477_v39  ;;  %v4133_v56 = vpack.c.bf16 %v3480_v11, %v3479_v41 }
 0x233   :  { %3603 = vmatprep.mubr.msk.f32.mxu1 %vm1012_vm12, %v921_v25  ;;  %v3481_v25 = vld [vmem:[%s5722_s6 + $0x20] sm:$0xff] }
 0x234   :  { %4124 = vmatpush1.bf16.msra.mxu1 %v4123_v22 }
 0x235   :  { %4125 = vmatprep.subr.bf16.mxu1 %v4557_v23 }
 0x238   :  { %4128 = vmatpush1.bf16.msk.msra.mxu1 %vm5430_vm9, %v4126_v27  ;;  %v4137_v27 = vpack.c.bf16 %v3482_v4, %v3481_v25 }
 0x239   :  { %4130 = vmatprep.subr.bf16.mxu1 %v4129_v46 }
 0x23b   :  { %1224 = vmatmul.mubr.f32.vlgmr.msra.gmra.mrb[8].mxu1 %v920_v63  ;;  %v3484_v63 = vld [vmem:[%s5722_s6 + $0x38] sm:$0xff] }
 0x23c   :  { %4132 = vmatpush3.bf16.msra.mxu1 %v4129_v46 }
 0x23d   :  { %4134 = vmatprep.subr.bf16.mxu1 %v4133_v56 }
 0x240   :  { %4136 = vmatpush3.bf16.msra.mxu1 %v4133_v56 }
 0x241   :  { %4138 = vmatprep.subr.bf16.mxu1 %v4137_v27 }
 0x244   :  { %4140 = vmatpush3.bf16.msra.mxu1 %v4137_v27 }
 0x2da   :  { %v3716_v23 = vpop.f32.mrb[6].mxu1 }
 0x2db   :  { %v3717_v5 = vpop.f32.mrb[7].mxu1 }
 0x2dc   :  { %v3718_v42 = vadd.f32 %v3717_v5, %v3716_v23  ;;  %v4141_v23 = vpack.c.bf16 %v3484_v63, %v3483_v7 }
 0x2de   :  { %4142 = vmatprep.subr.bf16.mxu1 %v4141_v23 }
 0x2df   :  { %4144 = vmatpush3.bf16.msra.mxu1 %v4141_v23 }
 0x2f7   :  { %v3751_v47 = vpop.f32.mrb[0].mxu0 }
 0x2f8   :  { %v3752_v60 = vpop.f32.mrb[1].mxu0 }
 0x2f9   :  { %v3753_v6 = vadd.f32 %v3752_v60, %v3751_v47  ;;  %v3486_v47 = vld [vmem:[%s5722_s6 + $0x48] sm:$0xff] }
 0x2fb   :  { %v1156_v35 = vadd.f32 %v3753_v6, %v3718_v42  ;;  %v3485_v42 = vld [vmem:[%s5722_s6 + $0x40] sm:$0xff] }
 0x2fc   :  { %v4145_v60 = vpack.c.bf16 %v3486_v47, %v3485_v42 }
 0x2fe   :  { %4146 = vmatprep.subr.bf16.mxu1 %v4145_v60 }
 0x2ff   :  { %4148 = vmatpush3.bf16.msra.mxu1 %v4145_v60 }
 0x30e   :  { %v1225_v15 = vpop.f32.mrb[8].mxu1 }
 0x30f   :  { %v5443_v37 = vadd.f32 %v1225_v15, %v1156_v35  ;;  %v1227_v52 = vpop.f32.mrb[9].mxu1 }
 0x311   :  { %1409 = vrot.lane.b32.xlu1 %v5443_v37, %s4537_s5  ;;  %1240 = vrot.lane.b32.xlu0 %v5443_v37, %s4538_s17  ;;  %s4561_s5 = smov 98   ;;  %s4562_s17 = smov 119  }
 0x315   :  { %1407 = vrot.lane.b32.xlu1 %v5452_v57, %s4559_s20  ;;  %1237 = vrot.lane.b32.xlu0 %v5452_v57, %s4558_s14  ;;  %s4580_s14 = smov 102  }
 0x319   :  { %1494 = vrot.lane.b32.xlu1 %v5439_v1, %s4560_s21  ;;  %1405 = vrot.lane.b32.xlu0 %v5439_v1, %s4559_s20 }
 0x31d   :  { %1587 = vrot.lane.b32.xlu1 %v5443_v37, %s4548_s26  ;;  %1498 = vrot.lane.b32.xlu0 %v5443_v37, %s4539_s0  ;;  %s4565_s0 = smov 117  }
 0x321   :  { %1585 = vrot.lane.b32.xlu1 %v5452_v57, %s4545_s23  ;;  %1496 = vrot.lane.b32.xlu0 %v5452_v57, %s4560_s21 }
 0x325   :  { %1672 = vrot.lane.b32.xlu1 %v5439_v1, %s4561_s5  ;;  %1583 = vrot.lane.b32.xlu0 %v5439_v1, %s4545_s23 }
 0x329   :  { %1765 = vrot.lane.b32.xlu1 %v5443_v37, %s4562_s17  ;;  %1676 = vrot.lane.b32.xlu0 %v5443_v37, %s4563_s22  ;;  %s4585_s17 = smov 2   ;;  %s4587_s22 = smov 95  }
 0x32d   :  { %1763 = vrot.lane.b32.xlu1 %v5452_v57, %s4564_s24  ;;  %1674 = vrot.lane.b32.xlu0 %v5452_v57, %s4561_s5 }
 0x331   :  { %1850 = vrot.lane.b32.xlu1 %v5439_v1, %s4549_s27  ;;  %1761 = vrot.lane.b32.xlu0 %v5439_v1, %s4564_s24 }
 0x335   :  { %1943 = vrot.lane.b32.xlu1 %v5443_v37, %s4565_s0  ;;  %1854 = vrot.lane.b32.xlu0 %v5443_v37, %s4566_s25 }
 0x339   :  { %1941 = vrot.lane.b32.xlu1 %v5452_v57, %s4567_s28  ;;  %1852 = vrot.lane.b32.xlu0 %v5452_v57, %s4549_s27  ;;  %s4571_s27 = smov 111  }
 0x33d   :  { %2028 = vrot.lane.b32.xlu1 %v5439_v1, %s4568_s29  ;;  %1939 = vrot.lane.b32.xlu0 %v5439_v1, %s4567_s28 }
 0x341   :  { %2121 = vrot.lane.b32.xlu1 %v5443_v37, %s4569_s8  ;;  %2032 = vrot.lane.b32.xlu0 %v5443_v37, %s4559_s20  ;;  %s4584_s20 = smov 100  }
 0x345   :  { %2119 = vrot.lane.b32.xlu1 %v5452_v57, %s4552_s30  ;;  %2030 = vrot.lane.b32.xlu0 %v5452_v57, %s4568_s29 }
 0x349   :  { %2206 = vrot.lane.b32.xlu1 %v5439_v1, %s4570_s9  ;;  %2117 = vrot.lane.b32.xlu0 %v5439_v1, %s4552_s30  ;;  %s4574_s30 = smov 44  }
 0x34d   :  { %2299 = vrot.lane.b32.xlu1 %v5443_v37, %s4560_s21  ;;  %2210 = vrot.lane.b32.xlu0 %v5443_v37, %s4571_s27 }
 0x351   :  { %2297 = vrot.lane.b32.xlu1 %v5452_v57, %s4572_s10  ;;  %2208 = vrot.lane.b32.xlu0 %v5452_v57, %s4570_s9 }
 0x355   :  { %2384 = vrot.lane.b32.xlu1 %v5439_v1, %s4573_s2  ;;  %2295 = vrot.lane.b32.xlu0 %v5439_v1, %s4572_s10 }
 0x359   :  { %2477 = vrot.lane.b32.xlu1 %v5443_v37, %s4541_s19  ;;  %2388 = vrot.lane.b32.xlu0 %v5443_v37, %s4540_s18  ;;  %s4577_s19 = smov 32   ;;  %s4578_s18 = smov 26  }
 0x35d   :  { %2475 = vrot.lane.b32.xlu1 %v5452_v57, %s4574_s30  ;;  %2386 = vrot.lane.b32.xlu0 %v5452_v57, %s4573_s2 }
 0x361   :  { %2562 = vrot.lane.b32.xlu1 %v5439_v1, %s4575_s11  ;;  %2473 = vrot.lane.b32.xlu0 %v5439_v1, %s4574_s30 }
 0x365   :  { %2655 = vrot.lane.b32.xlu1 %v5443_v37, %s4576_s1  ;;  %2566 = vrot.lane.b32.xlu0 %v5443_v37, %s4545_s23  ;;  %s4582_s23 = smov 14  }
 0x369   :  { %2653 = vrot.lane.b32.xlu1 %v5452_v57, %s4577_s19  ;;  %2564 = vrot.lane.b32.xlu0 %v5452_v57, %s4575_s11 }
 0x36d   :  { %2740 = vrot.lane.b32.xlu1 %v5439_v1, %s4578_s18  ;;  %2651 = vrot.lane.b32.xlu0 %v5439_v1, %s4577_s19 }
 0x371   :  { %2833 = vrot.lane.b32.xlu1 %v5443_v37, %s4579_s13  ;;  %2744 = vrot.lane.b32.xlu0 %v5443_v37, %s4580_s14 }
 0x375   :  { %2831 = vrot.lane.b32.xlu1 %v5452_v57, %s4581_s15  ;;  %2742 = vrot.lane.b32.xlu0 %v5452_v57, %s4578_s18 }
 0x379   :  { %2918 = vrot.lane.b32.xlu1 %v5439_v1, %s4582_s23  ;;  %2829 = vrot.lane.b32.xlu0 %v5439_v1, %s4581_s15 }
 0x37d   :  { %3011 = vrot.lane.b32.xlu1 %v5443_v37, %s4583_s16  ;;  %2922 = vrot.lane.b32.xlu0 %v5443_v37, %s4584_s20 }
 0x381   :  { %3009 = vrot.lane.b32.xlu1 %v5452_v57, %s4536_s12  ;;  %2920 = vrot.lane.b32.xlu0 %v5452_v57, %s4582_s23 }
 0x383   :  { %v1410_v17 = vpop.permute.xlu1 %1409  ;;  %v1241_v40 = vpop.permute.xlu0 %1240 }
 0x384   :  { %3843 = vmatprep.subr.msk.mxu0 %vm474_vm11, %v1241_v40 }
 0x385   :  { %3100 = vrot.lane.b32.xlu1 %v1230_v19, %s4585_s17  ;;  %3007 = vrot.lane.b32.xlu0 %v5439_v1, %s4536_s12  ;;  %s4586_s12 = smov 94  }
 0x386   :  { %3844 = vmatpush3.msk.msra.mxu0 %vm474_vm11, %v1241_v40 }
 0x387   :  { %3848 = vmatprep.subr.msk.mxu0 %vm474_vm11, %v5443_v37  ;;  %v1408_v32 = vpop.permute.xlu1 %1407  ;;  %v1238_v49 = vpop.permute.xlu0 %1237 }
 0x388   :  { %3846 = vmatmul.mubr.msk.f32.vlgmr.msra.gmra.mrb[2].mxu0 %vm1242_vm6, %v1238_v49 }
 0x389   :  { %3849 = vmatpush3.msk.msra.mxu0 %vm474_vm11, %v5443_v37  ;;  %3102 = vrot.lane.b32.xlu1 %v5452_v57, %s4585_s17 }
 0x38a   :  { %3098 = vrot.lane.b32.xlu0 %v5439_v1, %s4585_s17  ;;  %3853 = vmatprep.subr.msk.mxu0 %vm474_vm11, %v1410_v17 }
 0x38b   :  { %v1495_v34 = vpop.permute.xlu1 %1494  ;;  %v1406_v2 = vpop.permute.xlu0 %1405  ;;  %3850 = vmatprep.mubr.msk.f32.mxu0 %vm1242_vm6, %v5439_v1 }
 0x38d   :  { %3198 = vrot.lane.b32.xlu1 %v5443_v37, %s4586_s12 }
 0x38e   :  { %3109 = vrot.lane.b32.xlu0 %v5443_v37, %s4587_s22 }
 0x38f   :  { %v1588_v30 = vpop.permute.xlu1 %1587  ;;  %v1499_v14 = vpop.permute.xlu0 %1498 }
 0x390   :  { %3851 = vmatmul.mubr.msk.f32.vlgmr.msra.gmra.mrb[2].mxu0 %vm1242_vm6, %v5452_v57 }
 0x391   :  { %3854 = vmatpush3.msk.msra.mxu0 %vm474_vm11, %v1410_v17  ;;  %3196 = vrot.lane.b32.xlu1 %v1232_v3, %s4548_s26 }
 0x392   :  { %3104 = vrot.lane.b32.xlu0 %v1232_v3, %s4585_s17  ;;  %3858 = vmatprep.subr.msk.mxu0 %vm474_vm11, %v1499_v14 }
 0x393   :  { %v1586_v55 = vpop.permute.xlu1 %1585  ;;  %v1497_v21 = vpop.permute.xlu0 %1496  ;;  %3855 = vmatprep.mubr.msk.f32.mxu0 %vm1242_vm6, %v1406_v2 }
 0x395   :  { %3283 = vrot.lane.b32.xlu1 %v1230_v19, %s4566_s25 }
 0x396   :  { %3194 = vrot.lane.b32.xlu0 %v1230_v19, %s4548_s26 }
 0x397   :  { %v1673_v53 = vpop.permute.xlu1 %1672  ;;  %v1584_v38 = vpop.permute.xlu0 %1583 }
 0x398   :  { %3856 = vmatmul.mubr.msk.f32.vlgmr.msra.gmra.mrb[2].mxu0 %vm1242_vm6, %v1408_v32 }
 0x399   :  { %3859 = vmatpush3.msk.msra.mxu0 %vm474_vm11, %v1499_v14  ;;  %3376 = vrot.lane.b32.xlu1 %v5443_v37, %s4564_s24 }
 0x39a   :  { %3287 = vrot.lane.b32.xlu0 %v5443_v37, %s4588_s3  ;;  %3863 = vmatprep.subr.msk.mxu0 %vm474_vm11, %v1588_v30 }
 0x39b   :  { %v1766_v62 = vpop.permute.xlu1 %1765  ;;  %v1677_v0 = vpop.permute.xlu0 %1676  ;;  %3860 = vmatprep.mubr.msk.f32.mxu0 %vm1242_vm6, %v1495_v34 }
 0x39d   :  { %3374 = vrot.lane.b32.xlu1 %v1232_v3, %s4569_s8 }
 0x39e   :  { %3285 = vrot.lane.b32.xlu0 %v1232_v3, %s4566_s25 }
 0x39f   :  { %v1764_v10 = vpop.permute.xlu1 %1763  ;;  %v1675_v59 = vpop.permute.xlu0 %1674 }
 0x3a0   :  { %3861 = vmatmul.mubr.msk.f32.vlgmr.msra.gmra.mrb[2].mxu0 %vm1242_vm6, %v1497_v21 }
 0x3a1   :  { %3864 = vmatpush3.msk.msra.mxu0 %vm474_vm11, %v1588_v30  ;;  %3470 = vperm.xlu1 %4508, %v3462_v44  }
 0x3a2   :  { %3868 = vmatprep.subr.msk.mxu0 %vm474_vm11, %v1677_v0  ;;  %3865 = vmatprep.mubr.msk.f32.mxu0 %vm1242_vm6, %v1584_v38 }
 0x3a3   :  { %v1851_v26 = vpop.permute.xlu1 %1850  ;;  %v1762_v24 = vpop.permute.xlu0 %1761  ;;  %3372 = vrot.lane.b32.xlu0 %v1230_v19, %s4569_s8 }
 0x3a7   :  { %v1944_v12 = vpop.permute.xlu1 %1943  ;;  %v1855_v28 = vpop.permute.xlu0 %1854  ;;  %3465 = vperm.xlu0 %4509, %v3461_v43  }
 0x3a8   :  { %3866 = vmatmul.mubr.msk.f32.vlgmr.msra.gmra.mrb[2].mxu0 %vm1242_vm6, %v1586_v55 }
 0x3a9   :  { %3869 = vmatpush3.msk.msra.mxu0 %vm474_vm11, %v1677_v0  ;;  %3870 = vmatprep.mubr.msk.f32.mxu0 %vm1242_vm6, %v1673_v53 }
 0x3aa   :  { %3873 = vmatprep.subr.msk.mxu0 %vm474_vm11, %v1766_v62 }
 0x3ab   :  { %v1942_v58 = vpop.permute.xlu1 %1941  ;;  %v1853_v9 = vpop.permute.xlu0 %1852 }
 0x3af   :  { %v2029_v13 = vpop.permute.xlu1 %2028  ;;  %v1940_v45 = vpop.permute.xlu0 %1939 }
 0x3b0   :  { %3871 = vmatmul.mubr.msk.f32.vlgmr.msra.gmra.mrb[2].mxu0 %vm1242_vm6, %v1675_v59 }
 0x3b1   :  { %3874 = vmatpush3.msk.msra.mxu0 %vm474_vm11, %v1766_v62  ;;  %3875 = vmatprep.mubr.msk.f32.mxu0 %vm1242_vm6, %v1762_v24 }
 0x3b2   :  { %3878 = vmatprep.subr.msk.mxu0 %vm474_vm11, %v1855_v28 }
 0x3b3   :  { %v2033_v50 = vpop.permute.xlu0 %2032  ;;  %v2122_v29 = vpop.permute.xlu1 %2121 }
 0x3b7   :  { %v2031_v36 = vpop.permute.xlu0 %2030  ;;  %v2120_v51 = vpop.permute.xlu1 %2119 }
 0x3b8   :  { %3876 = vmatmul.mubr.msk.f32.vlgmr.msra.gmra.mrb[2].mxu0 %vm1242_vm6, %v1764_v10 }
 0x3b9   :  { %3879 = vmatpush3.msk.msra.mxu0 %vm474_vm11, %v1855_v28  ;;  %3880 = vmatprep.mubr.msk.f32.mxu0 %vm1242_vm6, %v1851_v26 }
 0x3ba   :  { %3883 = vmatprep.subr.msk.mxu0 %vm474_vm11, %v1944_v12 }
 0x3bb   :  { %v2118_v18 = vpop.permute.xlu0 %2117  ;;  %v2207_v31 = vpop.permute.xlu1 %2206 }
 0x3bf   :  { %v2211_v20 = vpop.permute.xlu0 %2210  ;;  %v2300_v54 = vpop.permute.xlu1 %2299 }
 0x3c0   :  { %3881 = vmatmul.mubr.msk.f32.vlgmr.msra.gmra.mrb[2].mxu0 %vm1242_vm6, %v1853_v9 }
 0x3c1   :  { %3884 = vmatpush3.msk.msra.mxu0 %vm474_vm11, %v1944_v12  ;;  %3885 = vmatprep.mubr.msk.f32.mxu0 %vm1242_vm6, %v1940_v45 }
 0x3c2   :  { %3888 = vmatprep.subr.msk.mxu0 %vm474_vm11, %v2033_v50 }
 0x3c3   :  { %v2209_v48 = vpop.permute.xlu0 %2208  ;;  %v2298_v8 = vpop.permute.xlu1 %2297 }
 0x3c7   :  { %v2296_v22 = vpop.permute.xlu0 %2295  ;;  %v2385_v5 = vpop.permute.xlu1 %2384 }
 0x3c8   :  { %3886 = vmatmul.mubr.msk.f32.vlgmr.msra.gmra.mrb[2].mxu0 %vm1242_vm6, %v1942_v58 }
 0x3c9   :  { %3889 = vmatpush3.msk.msra.mxu0 %vm474_vm11, %v2033_v50  ;;  %3890 = vmatprep.mubr.msk.f32.mxu0 %vm1242_vm6, %v2029_v13 }
 0x3ca   :  { %3893 = vmatprep.subr.msk.mxu0 %vm474_vm11, %v2122_v29 }
 0x3cb   :  { %v2389_v1 = vpop.permute.xlu0 %2388  ;;  %v2478_v35 = vpop.permute.xlu1 %2477 }
 0x3cf   :  { %v2387_v6 = vpop.permute.xlu0 %2386  ;;  %v2476_v15 = vpop.permute.xlu1 %2475 }
 0x3d0   :  { %3891 = vmatmul.mubr.msk.f32.vlgmr.msra.gmra.mrb[2].mxu0 %vm1242_vm6, %v2031_v36 }
 0x3d1   :  { %3894 = vmatpush3.msk.msra.mxu0 %vm474_vm11, %v2122_v29  ;;  %3895 = vmatprep.mubr.msk.f32.mxu0 %vm1242_vm6, %v2118_v18  ;;  %v3487_v18 = vld [vmem:[%s5722_s6 + $0x50] sm:$0xff] }
 0x3d2   :  { %3898 = vmatprep.subr.msk.mxu0 %vm474_vm11, %v2211_v20 }
 0x3d3   :  { %v2474_v61 = vpop.permute.xlu0 %2473  ;;  %v2563_v52 = vpop.permute.xlu1 %2562 }
 0x3d7   :  { %v2567_v37 = vpop.permute.xlu0 %2566  ;;  %v2656_v19 = vpop.permute.xlu1 %2655 }
 0x3d8   :  { %3896 = vmatmul.mubr.msk.f32.vlgmr.msra.gmra.mrb[2].mxu0 %vm1242_vm6, %v2120_v51 }
 0x3d9   :  { %3899 = vmatpush3.msk.msra.mxu0 %vm474_vm11, %v2211_v20  ;;  %3900 = vmatprep.mubr.msk.f32.mxu0 %vm1242_vm6, %v2207_v31  ;;  %v3488_v20 = vld [vmem:[%s5722_s6 + $0x58] sm:$0xf] }
 0x3da   :  { %3903 = vmatprep.subr.msk.mxu0 %vm474_vm11, %v2300_v54  ;;  %v4149_v31 = vpack.c.bf16 %v3488_v20, %v3487_v18 }
 0x3db   :  { %v2565_v57 = vpop.permute.xlu0 %2564  ;;  %v2654_v40 = vpop.permute.xlu1 %2653 }
 0x3dc   :  { %4151 = vmatprep.subr.msk.bf16.mxu1 %vm5430_vm9, %v4149_v31 }
 0x3dd   :  { %4154 = vmatpush3.bf16.msk.msra.mxu1 %vm5430_vm9, %v4149_v31 }
 0x3df   :  { %v2652_v17 = vpop.permute.xlu0 %2651  ;;  %v2741_v49 = vpop.permute.xlu1 %2740 }
 0x3e0   :  { %3901 = vmatmul.mubr.msk.f32.vlgmr.msra.gmra.mrb[2].mxu0 %vm1242_vm6, %v2209_v48 }
 0x3e1   :  { %3904 = vmatpush3.msk.msra.mxu0 %vm474_vm11, %v2300_v54  ;;  %3905 = vmatprep.mubr.msk.f32.mxu0 %vm1242_vm6, %v2296_v22 }
 0x3e2   :  { %3908 = vmatprep.subr.msk.mxu0 %vm474_vm11, %v2389_v1 }
 0x3e3   :  { %v2745_v32 = vpop.permute.xlu0 %2744  ;;  %v2834_v2 = vpop.permute.xlu1 %2833 }
 0x3e7   :  { %v2743_v34 = vpop.permute.xlu0 %2742  ;;  %v2832_v30 = vpop.permute.xlu1 %2831 }
 0x3e8   :  { %3906 = vmatmul.mubr.msk.f32.vlgmr.msra.gmra.mrb[2].mxu0 %vm1242_vm6, %v2298_v8 }
 0x3e9   :  { %3909 = vmatpush3.msk.msra.mxu0 %vm474_vm11, %v2389_v1  ;;  %3910 = vmatprep.mubr.msk.f32.mxu0 %vm1242_vm6, %v2385_v5 }
 0x3ea   :  { %3913 = vmatprep.subr.msk.mxu0 %vm474_vm11, %v2478_v35 }
 0x3eb   :  { %v2830_v3 = vpop.permute.xlu0 %2829  ;;  %v2919_v55 = vpop.permute.xlu1 %2918 }
 0x3ef   :  { %v2923_v14 = vpop.permute.xlu0 %2922  ;;  %v3012_v53 = vpop.permute.xlu1 %3011 }
 0x3f0   :  { %3911 = vmatmul.mubr.msk.f32.vlgmr.msra.gmra.mrb[2].mxu0 %vm1242_vm6, %v2387_v6 }
 0x3f1   :  { %3914 = vmatpush3.msk.msra.mxu0 %vm474_vm11, %v2478_v35  ;;  %3915 = vmatprep.mubr.msk.f32.mxu0 %vm1242_vm6, %v2474_v61 }
 0x3f2   :  { %3918 = vmatprep.subr.msk.mxu0 %vm474_vm11, %v2567_v37 }
 0x3f3   :  { %v2921_v21 = vpop.permute.xlu0 %2920  ;;  %v3010_v62 = vpop.permute.xlu1 %3009 }
 0x3f7   :  { %v3008_v38 = vpop.permute.xlu0 %3007  ;;  %v3101_v44 = vpop.permute.xlu1 %3100 }
 0x3f8   :  { %3916 = vmatmul.mubr.msk.f32.vlgmr.msra.gmra.mrb[2].mxu0 %vm1242_vm6, %v2476_v15 }
 0x3f9   :  { %3919 = vmatpush3.msk.msra.mxu0 %vm474_vm11, %v2567_v37  ;;  %3920 = vmatprep.mubr.msk.f32.mxu0 %vm1242_vm6, %v2563_v52 }
 0x3fa   :  { %3923 = vmatprep.subr.msk.mxu0 %vm474_vm11, %v2656_v19 }
 0x3fb   :  { %v3103_v59 = vpop.permute.xlu1 %3102 }
 0x3fc   :  { %v3099_v0 = vpop.permute.xlu0 %3098 }
 0x3fd   :  { %v3107_v24 = vsel %vm3106_vm14, %v3099_v0, %v3101_v44 }
 0x3ff   :  { %v3199_v12 = vpop.permute.xlu1 %3198 }
 0x400   :  { %3921 = vmatmul.mubr.msk.f32.vlgmr.msra.gmra.mrb[2].mxu0 %vm1242_vm6, %v2565_v57  ;;  %v3110_v10 = vpop.permute.xlu0 %3109 }
 0x401   :  { %3924 = vmatpush3.msk.msra.mxu0 %vm474_vm11, %v2656_v19  ;;  %3925 = vmatprep.mubr.msk.f32.mxu0 %vm1242_vm6, %v2652_v17 }
 0x402   :  { %3928 = vmatprep.subr.msk.mxu0 %vm474_vm11, %v2745_v32 }
 0x403   :  { %v3197_v58 = vpop.permute.xlu1 %3196 }
 0x404   :  { %v3105_v26 = vpop.permute.xlu0 %3104 }
 0x405   :  { %v3108_v9 = vsel %vm3106_vm14, %v3103_v59, %v3105_v26 }
 0x407   :  { %v3284_v45 = vpop.permute.xlu1 %3283 }
 0x408   :  { %3926 = vmatmul.mubr.msk.f32.vlgmr.msra.gmra.mrb[2].mxu0 %vm1242_vm6, %v2654_v40  ;;  %v3195_v28 = vpop.permute.xlu0 %3194 }
 0x409   :  { %3929 = vmatpush3.msk.msra.mxu0 %vm474_vm11, %v2745_v32  ;;  %3930 = vmatprep.mubr.msk.f32.mxu0 %vm1242_vm6, %v2741_v49 }
 0x40a   :  { %3933 = vmatprep.subr.msk.mxu0 %vm474_vm11, %v2834_v2 }
 0x40b   :  { %v3377_v50 = vpop.permute.xlu1 %3376 }
 0x40c   :  { %v3288_v13 = vpop.permute.xlu0 %3287 }
 0x40f   :  { %v3375_v51 = vpop.permute.xlu1 %3374 }
 0x410   :  { %3931 = vmatmul.mubr.msk.f32.vlgmr.msra.gmra.mrb[2].mxu0 %vm1242_vm6, %v2743_v34  ;;  %v3286_v29 = vpop.permute.xlu0 %3285 }
 0x411   :  { %3934 = vmatpush3.msk.msra.mxu0 %vm474_vm11, %v2834_v2  ;;  %3935 = vmatprep.mubr.msk.f32.mxu0 %vm1242_vm6, %v2830_v3 }
 0x412   :  { %3938 = vmatprep.subr.msk.mxu0 %vm474_vm11, %v2923_v14 }
 0x415   :  { %v3373_v36 = vpop.permute.xlu0 %3372 }
 0x418   :  { %3936 = vmatmul.mubr.msk.f32.vlgmr.msra.gmra.mrb[2].mxu0 %vm1242_vm6, %v2832_v30 }
 0x419   :  { %3939 = vmatpush3.msk.msra.mxu0 %vm474_vm11, %v2923_v14  ;;  %3940 = vmatprep.mubr.msk.f32.mxu0 %vm1242_vm6, %v2919_v55 }
 0x41a   :  { %3943 = vmatprep.subr.msk.mxu0 %vm474_vm11, %v3012_v53 }
 0x420   :  { %3941 = vmatmul.mubr.msk.f32.vlgmr.msra.gmra.mrb[2].mxu0 %vm1242_vm6, %v2921_v21  ;;  %v3471_v54 = vpop.permute.xlu1 %3470 }
 0x421   :  { %3944 = vmatpush3.msk.msra.mxu0 %vm474_vm11, %v3012_v53  ;;  %3945 = vmatprep.mubr.msk.f32.mxu0 %vm1242_vm6, %v3008_v38 }
 0x422   :  { %3948 = vmatprep.subr.msk.mxu0 %vm474_vm11, %v3110_v10 }
 0x426   :  { %v3466_v48 = vpop.permute.xlu0 %3465 }
 0x428   :  { %3946 = vmatmul.mubr.msk.f32.vlgmr.msra.gmra.mrb[2].mxu0 %vm1242_vm6, %v3010_v62 }
 0x429   :  { %3949 = vmatpush3.msk.msra.mxu0 %vm474_vm11, %v3110_v10  ;;  %3950 = vmatprep.mubr.msk.f32.mxu0 %vm1242_vm6, %v3107_v24 }
 0x42a   :  { %3953 = vmatprep.subr.msk.mxu0 %vm474_vm11, %v3199_v12 }
 0x430   :  { %3951 = vmatmul.mubr.msk.f32.vlgmr.msra.gmra.mrb[2].mxu0 %vm1242_vm6, %v3108_v9 }
 0x431   :  { %3954 = vmatpush3.msk.msra.mxu0 %vm474_vm11, %v3199_v12  ;;  %3955 = vmatprep.mubr.msk.f32.mxu0 %vm1242_vm6, %v3195_v28 }
 0x432   :  { %3958 = vmatprep.subr.msk.mxu0 %vm474_vm11, %v3288_v13 }
 0x438   :  { %3956 = vmatmul.mubr.msk.f32.vlgmr.msra.gmra.mrb[2].mxu0 %vm1242_vm6, %v3197_v58 }
 0x439   :  { %3959 = vmatpush3.msk.msra.mxu0 %vm474_vm11, %v3288_v13  ;;  %3960 = vmatprep.mubr.msk.f32.mxu0 %vm1242_vm6, %v3284_v45 }
 0x43a   :  { %3963 = vmatprep.subr.msk.mxu0 %vm474_vm11, %v3377_v50 }
 0x440   :  { %3961 = vmatmul.mubr.msk.f32.vlgmr.msra.gmra.mrb[2].mxu0 %vm1242_vm6, %v3286_v29 }
 0x441   :  { %3964 = vmatpush3.msk.msra.mxu0 %vm474_vm11, %v3377_v50  ;;  %3965 = vmatprep.mubr.msk.f32.mxu0 %vm1242_vm6, %v3373_v36  ;;  %vm3489_vm11 = vcmask 752640  }
 0x448   :  { %3966 = vmatmul.mubr.msk.f32.vlgmr.msra.gmra.mrb[2].mxu0 %vm1242_vm6, %v3375_v51 }
 0x51b   :  { %v3967_v43 = vpop.f32.mrb[2].mxu0 }
 0x51c   :  { %v3474_v39 = vadd.f32 %v3967_v43, %v3471_v54  ;;  %v3450_v33 = vpop.f32.mrb[3].mxu0 }
 0x51d   :  { %v3473_v46 = vadd.f32 %v3466_v48, %v3450_v33 }
 0x51e   :  { %v3476_v11 = vmax.f32 %v3474_v39, 0.0 }
 0x51f   :  { %v3475_v41 = vmax.f32 %v3473_v46, 0.0 }
 0x521   :  { %3992 = vmatprep.mubr.msk.f32.mxu1 %vm3489_vm11, %v3475_v41 }
 0x522   :  { %3993 = vmatmul.mubr.msk.f32.vlgmr.msra.gmra.mrb[10].mxu1 %vm3489_vm11, %v3476_v11 }
 0x5f5   :  { %v3994_v56 = vpop.f32.mrb[10].mxu1 }
 0x5f6   :  { %3576 = vst.msk [vmem:[%s5723_s7 + $0x8] sm:$0xff] %vm3574_vm2, %v3994_v56  ;;  %3581 = vrot.lane.b32.xlu0 %v3994_v56, %s4548_s26  ;;  %v3565_v16 = vpop.f32.mrb[11].mxu1 }
 0x5f7   :  { %3575 = vst.msk [vmem:[%s5723_s7] sm:$0xff] %vm3574_vm2, %v3565_v16  ;;  %3579 = vrot.lane.b32.xlu1 %v3565_v16, %s4548_s26 }
 0x668   :  { %v3582_v22 = vpop.permute.xlu0 %3581 }
 0x669   :  { %3683 = vst.msk [vmem:[%s5723_s7 + $0x18] sm:$0xff] %vm3574_vm2, %v3582_v22  ;;  %v3580_v25 = vpop.permute.xlu1 %3579 }
 0x66a   :  { %3682 = vst.msk [vmem:[%s5723_s7 + $0x10] sm:$0xff] %vm3574_vm2, %v3580_v25 }
 0x66b   :  { %3592 = vsyncpa [#allocation3], 1 }

</bundles_post_ra>
